<compile_context>
chip_gen: v6e
topology: v6e:2x2x1
jax: 0.10.0
libtpu: 0.0.40
codegen_flags: <defaults>
</compile_context>

<pallas_src>
import jax
import jax.numpy as jnp
from jax import lax
from jax.experimental import pallas as pl
from jax.experimental.pallas import tpu as pltpu

HIDDEN_SIZE = 64
INPUT_SIZE = 1
NUM_LAYERS = 2


def _lstm_cell(gates, c, gate_scale, gate_shift):
    """LSTM cell with gate columns reordered to [i | f | o | g] along the 4H axis.

    All four gate nonlinearities use a single tanh push via
    sigmoid(x) = 0.5 * tanh(0.5 * x) + 0.5:
      gate_scale = 0.5 on the i/f/o lanes, 1.0 on the g lanes
      gate_shift = 0.5 on the i/f/o lanes, 0.0 on the g lanes
    """
    H = HIDDEN_SIZE
    y = jnp.tanh(gates * gate_scale) * gate_scale + gate_shift
    i = y[:, 0:H]
    f = y[:, H:2 * H]
    o = y[:, 2 * H:3 * H]
    g = y[:, 3 * H:]
    c_new = f * c + i * g
    h_new = o * jnp.tanh(c_new)
    return h_new, c_new


def rnn_detector_kernel(rx_ref,    # VMEM f32[Tc, 1]    received symbols (time chunk)
                        wih0_ref,  # VMEM f32[1, 4H]    layer-0 input weights (reordered)
                        b0_ref,    # VMEM f32[1, 4H]    b_ih0 + b_hh0 (reordered)
                        whh0_ref,  # VMEM f32[H, 4H]    layer-0 recurrent weights (reordered)
                        wih1_ref,  # VMEM f32[H, 4H]    layer-1 input-path weights (reordered)
                        whh1_ref,  # VMEM f32[H, 4H]    layer-1 recurrent weights (reordered)
                        b1_ref,    # VMEM f32[1, 4H]    b_ih1 + b_hh1 (reordered)
                        wlin_ref,  # VMEM f32[H, Opad]  linear head weights (lane-padded)
                        blin_ref,  # VMEM f32[1, Opad]
                        out_ref,   # VMEM f32[Tc, Opad]
                        xg_buf,    # VMEM scratch f32[Tc, 4H]  in-kernel x-path gates
                        h1_buf,    # VMEM scratch f32[Tc, H]   h1(t) for the hoisted head
                        state):    # VMEM scratch f32[4, H]    rows: h0, c0, h1, c1
    H = HIDDEN_SIZE
    Tc = out_ref.shape[0]

    # Zero the persistent LSTM state only on the first T-chunk.
    @pl.when(pl.program_id(0) == 0)
    def _():
        state[...] = jnp.zeros_like(state)

    # In-kernel x-path precompute for the whole chunk (vectorized, off the serial chain):
    # xg[t, :] = rx[t] * W_ih0^T + (b_ih0 + b_hh0).
    xg_buf[...] = rx_ref[...] * wih0_ref[...] + b0_ref[...]

    # Per-lane sigmoid/tanh selectors, hoisted out of the time loop.
    lane = lax.broadcasted_iota(jnp.int32, (1, 4 * H), 1)
    is_sig = lane < 3 * H                                  # i, f, o lanes
    gate_scale = jnp.where(is_sig, 0.5, 1.0).astype(jnp.float32)
    gate_shift = jnp.where(is_sig, 0.5, 0.0).astype(jnp.float32)

    # Pull state into loop-carried values (live in vregs across the serial recurrence).
    h0 = state[0:1, :]
    c0 = state[1:2, :]
    h1 = state[2:3, :]
    c1 = state[3:4, :]

    def step(t, carry):
        h0, c0, h1, c1 = carry

        # Layer-1 recurrent partial: depends only on h1_prev, so it is issued up front
        # and can overlap the layer-0 matmul/cell below on the MXU.
        g1p = jnp.dot(h1, whh1_ref[...],
                      preferred_element_type=jnp.float32) + b1_ref[...]

        # Layer 0 (x-path + bias already folded into xg_buf rows).
        g0 = xg_buf[pl.ds(t, 1), :] + jnp.dot(
            h0, whh0_ref[...], preferred_element_type=jnp.float32)
        h0, c0 = _lstm_cell(g0, c0, gate_scale, gate_shift)

        # Layer 1: add the input-path partial computed from the fresh h0.
        g1 = g1p + jnp.dot(h0, wih1_ref[...], preferred_element_type=jnp.float32)
        h1, c1 = _lstm_cell(g1, c1, gate_scale, gate_shift)

        # Buffer layer-1 hidden state; linear head is applied after the loop.
        h1_buf[pl.ds(t, 1), :] = h1
        return (h0, c0, h1, c1)

    # TODO(synk): hold whh0/whh1/wih1 resident in the MXU with
    # pltpu.matmul_push_rhs / matmul_acc_lhs / matmul_pop to avoid re-streaming the
    # same RHS every step (and MRB in-place accumulation of the two layer-1 partials
    # on v7x); kept on jnp.dot here for portability/robust lowering.
    h0, c0, h1, c1 = lax.fori_loop(0, Tc, step, (h0, c0, h1, c1), unroll=8)

    # Persist state for the next T-chunk.
    state[0:1, :] = h0
    state[1:2, :] = c0
    state[2:3, :] = h1
    state[3:4, :] = c1

    # Hoisted linear head: one (Tc, H) @ (H, Opad) matmul + lane-dense block store.
    out_ref[...] = (jnp.dot(h1_buf[...], wlin_ref[...],
                            preferred_element_type=jnp.float32)
                    + blin_ref[...]).astype(out_ref.dtype)


def rnn_detector_forward(rx, kp, output_size, t_chunk=1024):
    """rx: f32[T] sequence of scalar received symbols. Returns f32[T, output_size]."""
    T = rx.shape[0]
    H = HIDDEN_SIZE
    O = output_size
    O_pad = ((O + 127) // 128) * 128   # lane-dense head / output store

    # T-chunk sizing: multiple of 8 sublanes, capped for VMEM residency.
    Tc = min(t_chunk, max(8, T))
    Tc = ((Tc + 7) // 8) * 8
    n_chunks = pl.cdiv(T, Tc)
    T_pad = n_chunks * Tc

    rx2 = rx[:, None].astype(jnp.float32)               # (T, 1)
    if T_pad != T:
        rx2 = jnp.pad(rx2, ((0, T_pad - T), (0, 0)))

    wlin = kp["wlin"]
    blin = kp["blin"]
    if O_pad != O:
        wlin = jnp.pad(wlin, ((0, 0), (0, O_pad - O)))
        blin = jnp.pad(blin, ((0, 0), (0, O_pad - O)))

    grid_spec = pltpu.PrefetchScalarGridSpec(
        num_scalar_prefetch=0,
        grid=(n_chunks,),
        in_specs=[
            pl.BlockSpec((Tc, 1), lambda i: (i, 0)),          # rx chunk
            pl.BlockSpec(kp["wih0"].shape, lambda i: (0, 0)),
            pl.BlockSpec(kp["b0"].shape, lambda i: (0, 0)),
            pl.BlockSpec(kp["whh0"].shape, lambda i: (0, 0)),
            pl.BlockSpec(kp["wih1"].shape, lambda i: (0, 0)),
            pl.BlockSpec(kp["whh1"].shape, lambda i: (0, 0)),
            pl.BlockSpec(kp["b1"].shape, lambda i: (0, 0)),
            pl.BlockSpec(wlin.shape, lambda i: (0, 0)),
            pl.BlockSpec(blin.shape, lambda i: (0, 0)),
        ],
        out_specs=pl.BlockSpec((Tc, O_pad), lambda i: (i, 0)),
        scratch_shapes=[
            pltpu.VMEM((Tc, 4 * H), jnp.float32),   # in-kernel x-path gates
            pltpu.VMEM((Tc, H), jnp.float32),       # h1 buffer for the hoisted head
            pltpu.VMEM((4, H), jnp.float32),        # persistent h0/c0/h1/c1
        ],
    )

    out = pl.pallas_call(
        rnn_detector_kernel,
        out_shape=jax.ShapeDtypeStruct((T_pad, O_pad), jnp.float32),
        grid_spec=grid_spec,
        compiler_params=pltpu.CompilerParams(
            dimension_semantics=("arbitrary",)),  # sequential recurrence over chunks
    )(rx2, kp["wih0"], kp["b0"], kp["whh0"], kp["wih1"], kp["whh1"],
      kp["b1"], wlin, blin)

    return out[:T, :O]


def make_params(memory_length, key):
    """Deterministic synthetic weights with PyTorch default-init scaling.

    Returns (torch_params, kernel_params):
      torch_params: raw PyTorch-shaped weights, canonical gate order (i, f, g, o).
      kernel_params: transposed / gate-reordered (i, f, o, g) weights for the kernel.
    """
    H = HIDDEN_SIZE
    O = 2 ** memory_length
    ks = jax.random.split(key, 10)
    k = 1.0 / jnp.sqrt(H)

    def u(kk, shape):
        return jax.random.uniform(kk, shape, jnp.float32, minval=-k, maxval=k)

    # PyTorch-shaped weights, gate order (i, f, g, o) stacked along dim 0.
    w_ih0 = u(ks[0], (4 * H, INPUT_SIZE))
    w_hh0 = u(ks[1], (4 * H, H))
    b_ih0 = u(ks[2], (4 * H,))
    b_hh0 = u(ks[3], (4 * H,))
    w_ih1 = u(ks[4], (4 * H, H))
    w_hh1 = u(ks[5], (4 * H, H))
    b_ih1 = u(ks[6], (4 * H,))
    b_hh1 = u(ks[7], (4 * H,))
    w_lin = u(ks[8], (O, H))
    b_lin = u(ks[9], (O,))

    torch_params = {
        "w_ih0": w_ih0, "w_hh0": w_hh0, "b_ih0": b_ih0, "b_hh0": b_hh0,
        "w_ih1": w_ih1, "w_hh1": w_hh1, "b_ih1": b_ih1, "b_hh1": b_hh1,
        "w_lin": w_lin, "b_lin": b_lin,
    }

    # Gate permutation (i, f, g, o) -> (i, f, o, g).
    perm = jnp.concatenate([
        jnp.arange(0, H), jnp.arange(H, 2 * H),
        jnp.arange(3 * H, 4 * H), jnp.arange(2 * H, 3 * H)])

    kernel_params = {
        "wih0": w_ih0[perm].T,                    # (1, 4H)
        "b0": (b_ih0 + b_hh0)[perm][None, :],     # (1, 4H)
        "whh0": w_hh0[perm].T,                    # (H, 4H)
        "wih1": w_ih1[perm].T,                    # (H, 4H)
        "whh1": w_hh1[perm].T,                    # (H, 4H)
        "b1": (b_ih1 + b_hh1)[perm][None, :],     # (1, 4H)
        "wlin": w_lin.T,                          # (H, O)
        "blin": b_lin[None, :],                   # (1, O)
    }
    return torch_params, kernel_params


def reference_forward(rx, tp):
    """Pure-JAX reference with canonical PyTorch gate order (i, f, g, o)."""
    H = HIDDEN_SIZE

    def cell(x, h, c, w_ih, w_hh, b_ih, b_hh):
        g = x @ w_ih.T + h @ w_hh.T + b_ih + b_hh
        i = jax.nn.sigmoid(g[:, 0:H])
        f = jax.nn.sigmoid(g[:, H:2 * H])
        gg = jnp.tanh(g[:, 2 * H:3 * H])
        o = jax.nn.sigmoid(g[:, 3 * H:4 * H])
        c = f * c + i * gg
        h = o * jnp.tanh(c)
        return h, c

    def step(state, x_t):
        h0, c0, h1, c1 = state
        x = x_t.reshape(1, 1)
        h0, c0 = cell(x, h0, c0, tp["w_ih0"], tp["w_hh0"], tp["b_ih0"], tp["b_hh0"])
        h1, c1 = cell(h0, h1, c1, tp["w_ih1"], tp["w_hh1"], tp["b_ih1"], tp["b_hh1"])
        y = h1 @ tp["w_lin"].T + tp["b_lin"]
        return (h0, c0, h1, c1), y[0]

    z = jnp.zeros((1, H), jnp.float32)
    _, ys = lax.scan(step, (z, z, z, z), rx)
    return ys


if __name__ == "__main__":
    memory_length = 4                 # output_size = 2**4 = 16
    T = 8                             # sequence length (== PyTorch rx batch dim)

    key = jax.random.PRNGKey(0)
    k_rx, k_w = jax.random.split(key)
    rx = jax.random.normal(k_rx, (T,), jnp.float32)   # PyTorch shape: [T, 1]
    torch_params, kernel_params = make_params(memory_length, k_w)

    out = rnn_detector_forward(rx, kernel_params, 2 ** memory_length)
    out = jax.block_until_ready(out)

    ref = jax.block_until_ready(reference_forward(rx, torch_params))
    assert out.shape == (T, 2 ** memory_length)
    assert jnp.allclose(out, ref, atol=1e-5, rtol=1e-5), float(jnp.max(jnp.abs(out - ref)))

    print("KERNEL_OK")
</pallas_src>

<mosaic_0001>
module attributes {stable_mosaic.version = 11 : i64} {
  func.func @rnn_detector_kernel(%arg0: i32, %arg1: memref<8x1xf32, #tpu.memory_space<vmem>>, %arg2: memref<1x256xf32, #tpu.memory_space<vmem>>, %arg3: memref<1x256xf32, #tpu.memory_space<vmem>>, %arg4: memref<64x256xf32, #tpu.memory_space<vmem>>, %arg5: memref<64x256xf32, #tpu.memory_space<vmem>>, %arg6: memref<64x256xf32, #tpu.memory_space<vmem>>, %arg7: memref<1x256xf32, #tpu.memory_space<vmem>>, %arg8: memref<64x128xf32, #tpu.memory_space<vmem>>, %arg9: memref<1x128xf32, #tpu.memory_space<vmem>>, %arg10: memref<8x128xf32, #tpu.memory_space<vmem>>, %arg11: memref<8x256xf32, #tpu.memory_space<vmem>>, %arg12: memref<8x64xf32, #tpu.memory_space<vmem>>, %arg13: memref<4x64xf32, #tpu.memory_space<vmem>>) attributes {dimension_semantics = [#tpu.dimension_semantics<arbitrary>], iteration_bounds = array<i64: 1>, scalar_prefetch = 0 : i64, scratch_operands = 3 : i64, tpu.core_type = #tpu.core_type<tc>, window_params = [{transform_indices = @transform_0, window_bounds = array<i64: 8, 1>}, {pipeline_mode = #tpu.pipeline_mode<synchronous>, transform_indices = @transform_1, window_bounds = array<i64: 1, 256>}, {pipeline_mode = #tpu.pipeline_mode<synchronous>, transform_indices = @transform_2, window_bounds = array<i64: 1, 256>}, {pipeline_mode = #tpu.pipeline_mode<synchronous>, transform_indices = @transform_3, window_bounds = array<i64: 64, 256>}, {pipeline_mode = #tpu.pipeline_mode<synchronous>, transform_indices = @transform_4, window_bounds = array<i64: 64, 256>}, {pipeline_mode = #tpu.pipeline_mode<synchronous>, transform_indices = @transform_5, window_bounds = array<i64: 64, 256>}, {pipeline_mode = #tpu.pipeline_mode<synchronous>, transform_indices = @transform_6, window_bounds = array<i64: 1, 256>}, {pipeline_mode = #tpu.pipeline_mode<synchronous>, transform_indices = @transform_7, window_bounds = array<i64: 64, 128>}, {pipeline_mode = #tpu.pipeline_mode<synchronous>, transform_indices = @transform_8, window_bounds = array<i64: 1, 128>}, {transform_indices = @transform_9, window_bounds = array<i64: 8, 128>}]} {
    %c0_i32 = arith.constant 0 : i32
    %0 = arith.cmpi eq, %arg0, %c0_i32 : i32
    %1 = arith.extui %0 : i1 to i32
    %c0_i32_0 = arith.constant 0 : i32
    %2 = arith.cmpi ne, %1, %c0_i32_0 : i32
    scf.if %2 {
      %cst_138 = arith.constant 0.000000e+00 : f32
      %356 = vector.broadcast %cst_138 : f32 to vector<4x64xf32>
      %c0_139 = arith.constant 0 : index
      %c0_140 = arith.constant 0 : index
      %357 = vector.load %arg13[%c0_139, %c0_140] : memref<4x64xf32, #tpu.memory_space<vmem>>, vector<4x64xf32>
      tpu.vector_store %arg13[%c0_139, %c0_140], %356 {strides = array<i32>} : memref<4x64xf32, #tpu.memory_space<vmem>>, vector<4x64xf32>,
    } else {
    }
    %c0 = arith.constant 0 : index
    %c0_1 = arith.constant 0 : index
    %3 = vector.load %arg1[%c0, %c0_1] : memref<8x1xf32, #tpu.memory_space<vmem>>, vector<8x1xf32>
    %c0_2 = arith.constant 0 : index
    %c0_3 = arith.constant 0 : index
    %4 = vector.load %arg2[%c0_2, %c0_3] : memref<1x256xf32, #tpu.memory_space<vmem>>, vector<1x256xf32>
    %5 = vector.broadcast %3 : vector<8x1xf32> to vector<8x256xf32>
    %6 = vector.broadcast %4 : vector<1x256xf32> to vector<8x256xf32>
    %7 = arith.mulf %5, %6 : vector<8x256xf32>
    %c0_4 = arith.constant 0 : index
    %c0_5 = arith.constant 0 : index
    %8 = vector.load %arg3[%c0_4, %c0_5] : memref<1x256xf32, #tpu.memory_space<vmem>>, vector<1x256xf32>
    %9 = vector.broadcast %8 : vector<1x256xf32> to vector<8x256xf32>
    %10 = arith.addf %7, %9 : vector<8x256xf32>
    %c0_6 = arith.constant 0 : index
    %c0_7 = arith.constant 0 : index
    %11 = vector.load %arg11[%c0_6, %c0_7] : memref<8x256xf32, #tpu.memory_space<vmem>>, vector<8x256xf32>
    tpu.vector_store %arg11[%c0_6, %c0_7], %10 {strides = array<i32>} : memref<8x256xf32, #tpu.memory_space<vmem>>, vector<8x256xf32>,
    %12 = tpu.iota {dimensions = array<i32: 1>} : vector<1x256xi32>
    %c192_i32 = arith.constant 192 : i32
    %13 = vector.broadcast %c192_i32 : i32 to vector<1x256xi32>
    %14 = arith.cmpi slt, %12, %13 : vector<1x256xi32>
    %cst = arith.constant 5.000000e-01 : f32
    %cst_8 = arith.constant 1.000000e+00 : f32
    %15 = vector.broadcast %cst : f32 to vector<1x256xf32>
    %16 = vector.broadcast %cst_8 : f32 to vector<1x256xf32>
    %17 = arith.select %14, %15, %16 : vector<1x256xi1>, vector<1x256xf32>
    %cst_9 = arith.constant 5.000000e-01 : f32
    %cst_10 = arith.constant 0.000000e+00 : f32
    %18 = vector.broadcast %cst_9 : f32 to vector<1x256xf32>
    %19 = vector.broadcast %cst_10 : f32 to vector<1x256xf32>
    %20 = arith.select %14, %18, %19 : vector<1x256xi1>, vector<1x256xf32>
    %c0_11 = arith.constant 0 : index
    %c0_12 = arith.constant 0 : index
    %21 = vector.load %arg13[%c0_11, %c0_12] : memref<4x64xf32, #tpu.memory_space<vmem>>, vector<1x64xf32>
    %c1 = arith.constant 1 : index
    %c0_13 = arith.constant 0 : index
    %22 = vector.load %arg13[%c1, %c0_13] : memref<4x64xf32, #tpu.memory_space<vmem>>, vector<1x64xf32>
    %c2 = arith.constant 2 : index
    %c0_14 = arith.constant 0 : index
    %23 = vector.load %arg13[%c2, %c0_14] : memref<4x64xf32, #tpu.memory_space<vmem>>, vector<1x64xf32>
    %c3 = arith.constant 3 : index
    %c0_15 = arith.constant 0 : index
    %24 = vector.load %arg13[%c3, %c0_15] : memref<4x64xf32, #tpu.memory_space<vmem>>, vector<1x64xf32>
    %c0_i32_16 = arith.constant 0 : i32
    %c0_17 = arith.constant 0 : index
    %c0_18 = arith.constant 0 : index
    %25 = vector.load %arg6[%c0_17, %c0_18] : memref<64x256xf32, #tpu.memory_space<vmem>>, vector<64x256xf32>
    %cst_19 = arith.constant dense<0.000000e+00> : vector<1x256xf32>
    %26 = tpu.matmul %23, %25, %cst_19 {dimension_numbers = #tpu.dot_dimension_numbers<[1], [0], [0], [1], [0, 0, 1, 1], [], []>} : vector<1x64xf32>, vector<64x256xf32>, vector<1x256xf32> -> vector<1x256xf32>
    %c0_20 = arith.constant 0 : index
    %c0_21 = arith.constant 0 : index
    %27 = vector.load %arg7[%c0_20, %c0_21] : memref<1x256xf32, #tpu.memory_space<vmem>>, vector<1x256xf32>
    %28 = arith.addf %26, %27 : vector<1x256xf32>
    %29 = arith.index_cast %c0_i32_16 : i32 to index
    %c0_22 = arith.constant 0 : index
    %30 = vector.load %arg11[%29, %c0_22] : memref<8x256xf32, #tpu.memory_space<vmem>>, vector<1x256xf32>
    %c0_23 = arith.constant 0 : index
    %c0_24 = arith.constant 0 : index
    %31 = vector.load %arg4[%c0_23, %c0_24] : memref<64x256xf32, #tpu.memory_space<vmem>>, vector<64x256xf32>
    %cst_25 = arith.constant dense<0.000000e+00> : vector<1x256xf32>
    %32 = tpu.matmul %21, %31, %cst_25 {dimension_numbers = #tpu.dot_dimension_numbers<[1], [0], [0], [1], [0, 0, 1, 1], [], []>} : vector<1x64xf32>, vector<64x256xf32>, vector<1x256xf32> -> vector<1x256xf32>
    %33 = arith.addf %30, %32 : vector<1x256xf32>
    %34 = arith.mulf %33, %17 : vector<1x256xf32>
    %35 = math.tanh %34 : vector<1x256xf32>
    %36 = arith.mulf %35, %17 : vector<1x256xf32>
    %37 = arith.addf %36, %20 : vector<1x256xf32>
    %38 = vector.extract_strided_slice %37 {offsets = [0, 0], sizes = [1, 64], strides = [1, 1]} : vector<1x256xf32> to vector<1x64xf32>
    %39 = vector.extract_strided_slice %37 {offsets = [0, 64], sizes = [1, 64], strides = [1, 1]} : vector<1x256xf32> to vector<1x64xf32>
    %40 = vector.extract_strided_slice %37 {offsets = [0, 128], sizes = [1, 64], strides = [1, 1]} : vector<1x256xf32> to vector<1x64xf32>
    %41 = vector.extract_strided_slice %37 {offsets = [0, 192], sizes = [1, 64], strides = [1, 1]} : vector<1x256xf32> to vector<1x64xf32>
    %42 = arith.mulf %39, %22 : vector<1x64xf32>
    %43 = arith.mulf %38, %41 : vector<1x64xf32>
    %44 = arith.addf %42, %43 : vector<1x64xf32>
    %45 = math.tanh %44 : vector<1x64xf32>
    %46 = arith.mulf %40, %45 : vector<1x64xf32>
    %c0_26 = arith.constant 0 : index
    %c0_27 = arith.constant 0 : index
    %47 = vector.load %arg5[%c0_26, %c0_27] : memref<64x256xf32, #tpu.memory_space<vmem>>, vector<64x256xf32>
    %cst_28 = arith.constant dense<0.000000e+00> : vector<1x256xf32>
    %48 = tpu.matmul %46, %47, %cst_28 {dimension_numbers = #tpu.dot_dimension_numbers<[1], [0], [0], [1], [0, 0, 1, 1], [], []>} : vector<1x64xf32>, vector<64x256xf32>, vector<1x256xf32> -> vector<1x256xf32>
    %49 = arith.addf %28, %48 : vector<1x256xf32>
    %50 = arith.mulf %49, %17 : vector<1x256xf32>
    %51 = math.tanh %50 : vector<1x256xf32>
    %52 = arith.mulf %51, %17 : vector<1x256xf32>
    %53 = arith.addf %52, %20 : vector<1x256xf32>
    %54 = vector.extract_strided_slice %53 {offsets = [0, 0], sizes = [1, 64], strides = [1, 1]} : vector<1x256xf32> to vector<1x64xf32>
    %55 = vector.extract_strided_slice %53 {offsets = [0, 64], sizes = [1, 64], strides = [1, 1]} : vector<1x256xf32> to vector<1x64xf32>
    %56 = vector.extract_strided_slice %53 {offsets = [0, 128], sizes = [1, 64], strides = [1, 1]} : vector<1x256xf32> to vector<1x64xf32>
    %57 = vector.extract_strided_slice %53 {offsets = [0, 192], sizes = [1, 64], strides = [1, 1]} : vector<1x256xf32> to vector<1x64xf32>
    %58 = arith.mulf %55, %24 : vector<1x64xf32>
    %59 = arith.mulf %54, %57 : vector<1x64xf32>
    %60 = arith.addf %58, %59 : vector<1x64xf32>
    %61 = math.tanh %60 : vector<1x64xf32>
    %62 = arith.mulf %56, %61 : vector<1x64xf32>
    %63 = arith.index_cast %c0_i32_16 : i32 to index
    %c0_29 = arith.constant 0 : index
    %64 = vector.load %arg12[%63, %c0_29] : memref<8x64xf32, #tpu.memory_space<vmem>>, vector<1x64xf32>
    tpu.vector_store %arg12[%63, %c0_29], %62 {strides = array<i32>} : memref<8x64xf32, #tpu.memory_space<vmem>>, vector<1x64xf32>,
    %c1_i32 = arith.constant 1 : i32
    %c0_30 = arith.constant 0 : index
    %c0_31 = arith.constant 0 : index
    %65 = vector.load %arg6[%c0_30, %c0_31] : memref<64x256xf32, #tpu.memory_space<vmem>>, vector<64x256xf32>
    %cst_32 = arith.constant dense<0.000000e+00> : vector<1x256xf32>
    %66 = tpu.matmul %62, %65, %cst_32 {dimension_numbers = #tpu.dot_dimension_numbers<[1], [0], [0], [1], [0, 0, 1, 1], [], []>} : vector<1x64xf32>, vector<64x256xf32>, vector<1x256xf32> -> vector<1x256xf32>
    %c0_33 = arith.constant 0 : index
    %c0_34 = arith.constant 0 : index
    %67 = vector.load %arg7[%c0_33, %c0_34] : memref<1x256xf32, #tpu.memory_space<vmem>>, vector<1x256xf32>
    %68 = arith.addf %66, %67 : vector<1x256xf32>
    %69 = arith.index_cast %c1_i32 : i32 to index
    %c0_35 = arith.constant 0 : index
    %70 = vector.load %arg11[%69, %c0_35] : memref<8x256xf32, #tpu.memory_space<vmem>>, vector<1x256xf32>
    %c0_36 = arith.constant 0 : index
    %c0_37 = arith.constant 0 : index
    %71 = vector.load %arg4[%c0_36, %c0_37] : memref<64x256xf32, #tpu.memory_space<vmem>>, vector<64x256xf32>
    %cst_38 = arith.constant dense<0.000000e+00> : vector<1x256xf32>
    %72 = tpu.matmul %46, %71, %cst_38 {dimension_numbers = #tpu.dot_dimension_numbers<[1], [0], [0], [1], [0, 0, 1, 1], [], []>} : vector<1x64xf32>, vector<64x256xf32>, vector<1x256xf32> -> vector<1x256xf32>
    %73 = arith.addf %70, %72 : vector<1x256xf32>
    %74 = arith.mulf %73, %17 : vector<1x256xf32>
    %75 = math.tanh %74 : vector<1x256xf32>
    %76 = arith.mulf %75, %17 : vector<1x256xf32>
    %77 = arith.addf %76, %20 : vector<1x256xf32>
    %78 = vector.extract_strided_slice %77 {offsets = [0, 0], sizes = [1, 64], strides = [1, 1]} : vector<1x256xf32> to vector<1x64xf32>
    %79 = vector.extract_strided_slice %77 {offsets = [0, 64], sizes = [1, 64], strides = [1, 1]} : vector<1x256xf32> to vector<1x64xf32>
    %80 = vector.extract_strided_slice %77 {offsets = [0, 128], sizes = [1, 64], strides = [1, 1]} : vector<1x256xf32> to vector<1x64xf32>
    %81 = vector.extract_strided_slice %77 {offsets = [0, 192], sizes = [1, 64], strides = [1, 1]} : vector<1x256xf32> to vector<1x64xf32>
    %82 = arith.mulf %79, %44 : vector<1x64xf32>
    %83 = arith.mulf %78, %81 : vector<1x64xf32>
    %84 = arith.addf %82, %83 : vector<1x64xf32>
    %85 = math.tanh %84 : vector<1x64xf32>
    %86 = arith.mulf %80, %85 : vector<1x64xf32>
    %c0_39 = arith.constant 0 : index
    %c0_40 = arith.constant 0 : index
    %87 = vector.load %arg5[%c0_39, %c0_40] : memref<64x256xf32, #tpu.memory_space<vmem>>, vector<64x256xf32>
    %cst_41 = arith.constant dense<0.000000e+00> : vector<1x256xf32>
    %88 = tpu.matmul %86, %87, %cst_41 {dimension_numbers = #tpu.dot_dimension_numbers<[1], [0], [0], [1], [0, 0, 1, 1], [], []>} : vector<1x64xf32>, vector<64x256xf32>, vector<1x256xf32> -> vector<1x256xf32>
    %89 = arith.addf %68, %88 : vector<1x256xf32>
    %90 = arith.mulf %89, %17 : vector<1x256xf32>
    %91 = math.tanh %90 : vector<1x256xf32>
    %92 = arith.mulf %91, %17 : vector<1x256xf32>
    %93 = arith.addf %92, %20 : vector<1x256xf32>
    %94 = vector.extract_strided_slice %93 {offsets = [0, 0], sizes = [1, 64], strides = [1, 1]} : vector<1x256xf32> to vector<1x64xf32>
    %95 = vector.extract_strided_slice %93 {offsets = [0, 64], sizes = [1, 64], strides = [1, 1]} : vector<1x256xf32> to vector<1x64xf32>
    %96 = vector.extract_strided_slice %93 {offsets = [0, 128], sizes = [1, 64], strides = [1, 1]} : vector<1x256xf32> to vector<1x64xf32>
    %97 = vector.extract_strided_slice %93 {offsets = [0, 192], sizes = [1, 64], strides = [1, 1]} : vector<1x256xf32> to vector<1x64xf32>
    %98 = arith.mulf %95, %60 : vector<1x64xf32>
    %99 = arith.mulf %94, %97 : vector<1x64xf32>
    %100 = arith.addf %98, %99 : vector<1x64xf32>
    %101 = math.tanh %100 : vector<1x64xf32>
    %102 = arith.mulf %96, %101 : vector<1x64xf32>
    %103 = arith.index_cast %c1_i32 : i32 to index
    %c0_42 = arith.constant 0 : index
    %104 = vector.load %arg12[%103, %c0_42] : memref<8x64xf32, #tpu.memory_space<vmem>>, vector<1x64xf32>
    tpu.vector_store %arg12[%103, %c0_42], %102 {strides = array<i32>} : memref<8x64xf32, #tpu.memory_space<vmem>>, vector<1x64xf32>,
    %c2_i32 = arith.constant 2 : i32
    %c0_43 = arith.constant 0 : index
    %c0_44 = arith.constant 0 : index
    %105 = vector.load %arg6[%c0_43, %c0_44] : memref<64x256xf32, #tpu.memory_space<vmem>>, vector<64x256xf32>
    %cst_45 = arith.constant dense<0.000000e+00> : vector<1x256xf32>
    %106 = tpu.matmul %102, %105, %cst_45 {dimension_numbers = #tpu.dot_dimension_numbers<[1], [0], [0], [1], [0, 0, 1, 1], [], []>} : vector<1x64xf32>, vector<64x256xf32>, vector<1x256xf32> -> vector<1x256xf32>
    %c0_46 = arith.constant 0 : index
    %c0_47 = arith.constant 0 : index
    %107 = vector.load %arg7[%c0_46, %c0_47] : memref<1x256xf32, #tpu.memory_space<vmem>>, vector<1x256xf32>
    %108 = arith.addf %106, %107 : vector<1x256xf32>
    %109 = arith.index_cast %c2_i32 : i32 to index
    %c0_48 = arith.constant 0 : index
    %110 = vector.load %arg11[%109, %c0_48] : memref<8x256xf32, #tpu.memory_space<vmem>>, vector<1x256xf32>
    %c0_49 = arith.constant 0 : index
    %c0_50 = arith.constant 0 : index
    %111 = vector.load %arg4[%c0_49, %c0_50] : memref<64x256xf32, #tpu.memory_space<vmem>>, vector<64x256xf32>
    %cst_51 = arith.constant dense<0.000000e+00> : vector<1x256xf32>
    %112 = tpu.matmul %86, %111, %cst_51 {dimension_numbers = #tpu.dot_dimension_numbers<[1], [0], [0], [1], [0, 0, 1, 1], [], []>} : vector<1x64xf32>, vector<64x256xf32>, vector<1x256xf32> -> vector<1x256xf32>
    %113 = arith.addf %110, %112 : vector<1x256xf32>
    %114 = arith.mulf %113, %17 : vector<1x256xf32>
    %115 = math.tanh %114 : vector<1x256xf32>
    %116 = arith.mulf %115, %17 : vector<1x256xf32>
    %117 = arith.addf %116, %20 : vector<1x256xf32>
    %118 = vector.extract_strided_slice %117 {offsets = [0, 0], sizes = [1, 64], strides = [1, 1]} : vector<1x256xf32> to vector<1x64xf32>
    %119 = vector.extract_strided_slice %117 {offsets = [0, 64], sizes = [1, 64], strides = [1, 1]} : vector<1x256xf32> to vector<1x64xf32>
    %120 = vector.extract_strided_slice %117 {offsets = [0, 128], sizes = [1, 64], strides = [1, 1]} : vector<1x256xf32> to vector<1x64xf32>
    %121 = vector.extract_strided_slice %117 {offsets = [0, 192], sizes = [1, 64], strides = [1, 1]} : vector<1x256xf32> to vector<1x64xf32>
    %122 = arith.mulf %119, %84 : vector<1x64xf32>
    %123 = arith.mulf %118, %121 : vector<1x64xf32>
    %124 = arith.addf %122, %123 : vector<1x64xf32>
    %125 = math.tanh %124 : vector<1x64xf32>
    %126 = arith.mulf %120, %125 : vector<1x64xf32>
    %c0_52 = arith.constant 0 : index
    %c0_53 = arith.constant 0 : index
    %127 = vector.load %arg5[%c0_52, %c0_53] : memref<64x256xf32, #tpu.memory_space<vmem>>, vector<64x256xf32>
    %cst_54 = arith.constant dense<0.000000e+00> : vector<1x256xf32>
    %128 = tpu.matmul %126, %127, %cst_54 {dimension_numbers = #tpu.dot_dimension_numbers<[1], [0], [0], [1], [0, 0, 1, 1], [], []>} : vector<1x64xf32>, vector<64x256xf32>, vector<1x256xf32> -> vector<1x256xf32>
    %129 = arith.addf %108, %128 : vector<1x256xf32>
    %130 = arith.mulf %129, %17 : vector<1x256xf32>
    %131 = math.tanh %130 : vector<1x256xf32>
    %132 = arith.mulf %131, %17 : vector<1x256xf32>
    %133 = arith.addf %132, %20 : vector<1x256xf32>
    %134 = vector.extract_strided_slice %133 {offsets = [0, 0], sizes = [1, 64], strides = [1, 1]} : vector<1x256xf32> to vector<1x64xf32>
    %135 = vector.extract_strided_slice %133 {offsets = [0, 64], sizes = [1, 64], strides = [1, 1]} : vector<1x256xf32> to vector<1x64xf32>
    %136 = vector.extract_strided_slice %133 {offsets = [0, 128], sizes = [1, 64], strides = [1, 1]} : vector<1x256xf32> to vector<1x64xf32>
    %137 = vector.extract_strided_slice %133 {offsets = [0, 192], sizes = [1, 64], strides = [1, 1]} : vector<1x256xf32> to vector<1x64xf32>
    %138 = arith.mulf %135, %100 : vector<1x64xf32>
    %139 = arith.mulf %134, %137 : vector<1x64xf32>
    %140 = arith.addf %138, %139 : vector<1x64xf32>
    %141 = math.tanh %140 : vector<1x64xf32>
    %142 = arith.mulf %136, %141 : vector<1x64xf32>
    %143 = arith.index_cast %c2_i32 : i32 to index
    %c0_55 = arith.constant 0 : index
    %144 = vector.load %arg12[%143, %c0_55] : memref<8x64xf32, #tpu.memory_space<vmem>>, vector<1x64xf32>
    tpu.vector_store %arg12[%143, %c0_55], %142 {strides = array<i32>} : memref<8x64xf32, #tpu.memory_space<vmem>>, vector<1x64xf32>,
    %c3_i32 = arith.constant 3 : i32
    %c0_56 = arith.constant 0 : index
    %c0_57 = arith.constant 0 : index
    %145 = vector.load %arg6[%c0_56, %c0_57] : memref<64x256xf32, #tpu.memory_space<vmem>>, vector<64x256xf32>
    %cst_58 = arith.constant dense<0.000000e+00> : vector<1x256xf32>
    %146 = tpu.matmul %142, %145, %cst_58 {dimension_numbers = #tpu.dot_dimension_numbers<[1], [0], [0], [1], [0, 0, 1, 1], [], []>} : vector<1x64xf32>, vector<64x256xf32>, vector<1x256xf32> -> vector<1x256xf32>
    %c0_59 = arith.constant 0 : index
    %c0_60 = arith.constant 0 : index
    %147 = vector.load %arg7[%c0_59, %c0_60] : memref<1x256xf32, #tpu.memory_space<vmem>>, vector<1x256xf32>
    %148 = arith.addf %146, %147 : vector<1x256xf32>
    %149 = arith.index_cast %c3_i32 : i32 to index
    %c0_61 = arith.constant 0 : index
    %150 = vector.load %arg11[%149, %c0_61] : memref<8x256xf32, #tpu.memory_space<vmem>>, vector<1x256xf32>
    %c0_62 = arith.constant 0 : index
    %c0_63 = arith.constant 0 : index
    %151 = vector.load %arg4[%c0_62, %c0_63] : memref<64x256xf32, #tpu.memory_space<vmem>>, vector<64x256xf32>
    %cst_64 = arith.constant dense<0.000000e+00> : vector<1x256xf32>
    %152 = tpu.matmul %126, %151, %cst_64 {dimension_numbers = #tpu.dot_dimension_numbers<[1], [0], [0], [1], [0, 0, 1, 1], [], []>} : vector<1x64xf32>, vector<64x256xf32>, vector<1x256xf32> -> vector<1x256xf32>
    %153 = arith.addf %150, %152 : vector<1x256xf32>
    %154 = arith.mulf %153, %17 : vector<1x256xf32>
    %155 = math.tanh %154 : vector<1x256xf32>
    %156 = arith.mulf %155, %17 : vector<1x256xf32>
    %157 = arith.addf %156, %20 : vector<1x256xf32>
    %158 = vector.extract_strided_slice %157 {offsets = [0, 0], sizes = [1, 64], strides = [1, 1]} : vector<1x256xf32> to vector<1x64xf32>
    %159 = vector.extract_strided_slice %157 {offsets = [0, 64], sizes = [1, 64], strides = [1, 1]} : vector<1x256xf32> to vector<1x64xf32>
    %160 = vector.extract_strided_slice %157 {offsets = [0, 128], sizes = [1, 64], strides = [1, 1]} : vector<1x256xf32> to vector<1x64xf32>
    %161 = vector.extract_strided_slice %157 {offsets = [0, 192], sizes = [1, 64], strides = [1, 1]} : vector<1x256xf32> to vector<1x64xf32>
    %162 = arith.mulf %159, %124 : vector<1x64xf32>
    %163 = arith.mulf %158, %161 : vector<1x64xf32>
    %164 = arith.addf %162, %163 : vector<1x64xf32>
    %165 = math.tanh %164 : vector<1x64xf32>
    %166 = arith.mulf %160, %165 : vector<1x64xf32>
    %c0_65 = arith.constant 0 : index
    %c0_66 = arith.constant 0 : index
    %167 = vector.load %arg5[%c0_65, %c0_66] : memref<64x256xf32, #tpu.memory_space<vmem>>, vector<64x256xf32>
    %cst_67 = arith.constant dense<0.000000e+00> : vector<1x256xf32>
    %168 = tpu.matmul %166, %167, %cst_67 {dimension_numbers = #tpu.dot_dimension_numbers<[1], [0], [0], [1], [0, 0, 1, 1], [], []>} : vector<1x64xf32>, vector<64x256xf32>, vector<1x256xf32> -> vector<1x256xf32>
    %169 = arith.addf %148, %168 : vector<1x256xf32>
    %170 = arith.mulf %169, %17 : vector<1x256xf32>
    %171 = math.tanh %170 : vector<1x256xf32>
    %172 = arith.mulf %171, %17 : vector<1x256xf32>
    %173 = arith.addf %172, %20 : vector<1x256xf32>
    %174 = vector.extract_strided_slice %173 {offsets = [0, 0], sizes = [1, 64], strides = [1, 1]} : vector<1x256xf32> to vector<1x64xf32>
    %175 = vector.extract_strided_slice %173 {offsets = [0, 64], sizes = [1, 64], strides = [1, 1]} : vector<1x256xf32> to vector<1x64xf32>
    %176 = vector.extract_strided_slice %173 {offsets = [0, 128], sizes = [1, 64], strides = [1, 1]} : vector<1x256xf32> to vector<1x64xf32>
    %177 = vector.extract_strided_slice %173 {offsets = [0, 192], sizes = [1, 64], strides = [1, 1]} : vector<1x256xf32> to vector<1x64xf32>
    %178 = arith.mulf %175, %140 : vector<1x64xf32>
    %179 = arith.mulf %174, %177 : vector<1x64xf32>
    %180 = arith.addf %178, %179 : vector<1x64xf32>
    %181 = math.tanh %180 : vector<1x64xf32>
    %182 = arith.mulf %176, %181 : vector<1x64xf32>
    %183 = arith.index_cast %c3_i32 : i32 to index
    %c0_68 = arith.constant 0 : index
    %184 = vector.load %arg12[%183, %c0_68] : memref<8x64xf32, #tpu.memory_space<vmem>>, vector<1x64xf32>
    tpu.vector_store %arg12[%183, %c0_68], %182 {strides = array<i32>} : memref<8x64xf32, #tpu.memory_space<vmem>>, vector<1x64xf32>,
    %c4_i32 = arith.constant 4 : i32
    %c0_69 = arith.constant 0 : index
    %c0_70 = arith.constant 0 : index
    %185 = vector.load %arg6[%c0_69, %c0_70] : memref<64x256xf32, #tpu.memory_space<vmem>>, vector<64x256xf32>
    %cst_71 = arith.constant dense<0.000000e+00> : vector<1x256xf32>
    %186 = tpu.matmul %182, %185, %cst_71 {dimension_numbers = #tpu.dot_dimension_numbers<[1], [0], [0], [1], [0, 0, 1, 1], [], []>} : vector<1x64xf32>, vector<64x256xf32>, vector<1x256xf32> -> vector<1x256xf32>
    %c0_72 = arith.constant 0 : index
    %c0_73 = arith.constant 0 : index
    %187 = vector.load %arg7[%c0_72, %c0_73] : memref<1x256xf32, #tpu.memory_space<vmem>>, vector<1x256xf32>
    %188 = arith.addf %186, %187 : vector<1x256xf32>
    %189 = arith.index_cast %c4_i32 : i32 to index
    %c0_74 = arith.constant 0 : index
    %190 = vector.load %arg11[%189, %c0_74] : memref<8x256xf32, #tpu.memory_space<vmem>>, vector<1x256xf32>
    %c0_75 = arith.constant 0 : index
    %c0_76 = arith.constant 0 : index
    %191 = vector.load %arg4[%c0_75, %c0_76] : memref<64x256xf32, #tpu.memory_space<vmem>>, vector<64x256xf32>
    %cst_77 = arith.constant dense<0.000000e+00> : vector<1x256xf32>
    %192 = tpu.matmul %166, %191, %cst_77 {dimension_numbers = #tpu.dot_dimension_numbers<[1], [0], [0], [1], [0, 0, 1, 1], [], []>} : vector<1x64xf32>, vector<64x256xf32>, vector<1x256xf32> -> vector<1x256xf32>
    %193 = arith.addf %190, %192 : vector<1x256xf32>
    %194 = arith.mulf %193, %17 : vector<1x256xf32>
    %195 = math.tanh %194 : vector<1x256xf32>
    %196 = arith.mulf %195, %17 : vector<1x256xf32>
    %197 = arith.addf %196, %20 : vector<1x256xf32>
    %198 = vector.extract_strided_slice %197 {offsets = [0, 0], sizes = [1, 64], strides = [1, 1]} : vector<1x256xf32> to vector<1x64xf32>
    %199 = vector.extract_strided_slice %197 {offsets = [0, 64], sizes = [1, 64], strides = [1, 1]} : vector<1x256xf32> to vector<1x64xf32>
    %200 = vector.extract_strided_slice %197 {offsets = [0, 128], sizes = [1, 64], strides = [1, 1]} : vector<1x256xf32> to vector<1x64xf32>
    %201 = vector.extract_strided_slice %197 {offsets = [0, 192], sizes = [1, 64], strides = [1, 1]} : vector<1x256xf32> to vector<1x64xf32>
    %202 = arith.mulf %199, %164 : vector<1x64xf32>
    %203 = arith.mulf %198, %201 : vector<1x64xf32>
    %204 = arith.addf %202, %203 : vector<1x64xf32>
    %205 = math.tanh %204 : vector<1x64xf32>
    %206 = arith.mulf %200, %205 : vector<1x64xf32>
    %c0_78 = arith.constant 0 : index
    %c0_79 = arith.constant 0 : index
    %207 = vector.load %arg5[%c0_78, %c0_79] : memref<64x256xf32, #tpu.memory_space<vmem>>, vector<64x256xf32>
    %cst_80 = arith.constant dense<0.000000e+00> : vector<1x256xf32>
    %208 = tpu.matmul %206, %207, %cst_80 {dimension_numbers = #tpu.dot_dimension_numbers<[1], [0], [0], [1], [0, 0, 1, 1], [], []>} : vector<1x64xf32>, vector<64x256xf32>, vector<1x256xf32> -> vector<1x256xf32>
    %209 = arith.addf %188, %208 : vector<1x256xf32>
    %210 = arith.mulf %209, %17 : vector<1x256xf32>
    %211 = math.tanh %210 : vector<1x256xf32>
    %212 = arith.mulf %211, %17 : vector<1x256xf32>
    %213 = arith.addf %212, %20 : vector<1x256xf32>
    %214 = vector.extract_strided_slice %213 {offsets = [0, 0], sizes = [1, 64], strides = [1, 1]} : vector<1x256xf32> to vector<1x64xf32>
    %215 = vector.extract_strided_slice %213 {offsets = [0, 64], sizes = [1, 64], strides = [1, 1]} : vector<1x256xf32> to vector<1x64xf32>
    %216 = vector.extract_strided_slice %213 {offsets = [0, 128], sizes = [1, 64], strides = [1, 1]} : vector<1x256xf32> to vector<1x64xf32>
    %217 = vector.extract_strided_slice %213 {offsets = [0, 192], sizes = [1, 64], strides = [1, 1]} : vector<1x256xf32> to vector<1x64xf32>
    %218 = arith.mulf %215, %180 : vector<1x64xf32>
    %219 = arith.mulf %214, %217 : vector<1x64xf32>
    %220 = arith.addf %218, %219 : vector<1x64xf32>
    %221 = math.tanh %220 : vector<1x64xf32>
    %222 = arith.mulf %216, %221 : vector<1x64xf32>
    %223 = arith.index_cast %c4_i32 : i32 to index
    %c0_81 = arith.constant 0 : index
    %224 = vector.load %arg12[%223, %c0_81] : memref<8x64xf32, #tpu.memory_space<vmem>>, vector<1x64xf32>
    tpu.vector_store %arg12[%223, %c0_81], %222 {strides = array<i32>} : memref<8x64xf32, #tpu.memory_space<vmem>>, vector<1x64xf32>,
    %c5_i32 = arith.constant 5 : i32
    %c0_82 = arith.constant 0 : index
    %c0_83 = arith.constant 0 : index
    %225 = vector.load %arg6[%c0_82, %c0_83] : memref<64x256xf32, #tpu.memory_space<vmem>>, vector<64x256xf32>
    %cst_84 = arith.constant dense<0.000000e+00> : vector<1x256xf32>
    %226 = tpu.matmul %222, %225, %cst_84 {dimension_numbers = #tpu.dot_dimension_numbers<[1], [0], [0], [1], [0, 0, 1, 1], [], []>} : vector<1x64xf32>, vector<64x256xf32>, vector<1x256xf32> -> vector<1x256xf32>
    %c0_85 = arith.constant 0 : index
    %c0_86 = arith.constant 0 : index
    %227 = vector.load %arg7[%c0_85, %c0_86] : memref<1x256xf32, #tpu.memory_space<vmem>>, vector<1x256xf32>
    %228 = arith.addf %226, %227 : vector<1x256xf32>
    %229 = arith.index_cast %c5_i32 : i32 to index
    %c0_87 = arith.constant 0 : index
    %230 = vector.load %arg11[%229, %c0_87] : memref<8x256xf32, #tpu.memory_space<vmem>>, vector<1x256xf32>
    %c0_88 = arith.constant 0 : index
    %c0_89 = arith.constant 0 : index
    %231 = vector.load %arg4[%c0_88, %c0_89] : memref<64x256xf32, #tpu.memory_space<vmem>>, vector<64x256xf32>
    %cst_90 = arith.constant dense<0.000000e+00> : vector<1x256xf32>
    %232 = tpu.matmul %206, %231, %cst_90 {dimension_numbers = #tpu.dot_dimension_numbers<[1], [0], [0], [1], [0, 0, 1, 1], [], []>} : vector<1x64xf32>, vector<64x256xf32>, vector<1x256xf32> -> vector<1x256xf32>
    %233 = arith.addf %230, %232 : vector<1x256xf32>
    %234 = arith.mulf %233, %17 : vector<1x256xf32>
    %235 = math.tanh %234 : vector<1x256xf32>
    %236 = arith.mulf %235, %17 : vector<1x256xf32>
    %237 = arith.addf %236, %20 : vector<1x256xf32>
    %238 = vector.extract_strided_slice %237 {offsets = [0, 0], sizes = [1, 64], strides = [1, 1]} : vector<1x256xf32> to vector<1x64xf32>
    %239 = vector.extract_strided_slice %237 {offsets = [0, 64], sizes = [1, 64], strides = [1, 1]} : vector<1x256xf32> to vector<1x64xf32>
    %240 = vector.extract_strided_slice %237 {offsets = [0, 128], sizes = [1, 64], strides = [1, 1]} : vector<1x256xf32> to vector<1x64xf32>
    %241 = vector.extract_strided_slice %237 {offsets = [0, 192], sizes = [1, 64], strides = [1, 1]} : vector<1x256xf32> to vector<1x64xf32>
    %242 = arith.mulf %239, %204 : vector<1x64xf32>
    %243 = arith.mulf %238, %241 : vector<1x64xf32>
    %244 = arith.addf %242, %243 : vector<1x64xf32>
    %245 = math.tanh %244 : vector<1x64xf32>
    %246 = arith.mulf %240, %245 : vector<1x64xf32>
    %c0_91 = arith.constant 0 : index
    %c0_92 = arith.constant 0 : index
    %247 = vector.load %arg5[%c0_91, %c0_92] : memref<64x256xf32, #tpu.memory_space<vmem>>, vector<64x256xf32>
    %cst_93 = arith.constant dense<0.000000e+00> : vector<1x256xf32>
    %248 = tpu.matmul %246, %247, %cst_93 {dimension_numbers = #tpu.dot_dimension_numbers<[1], [0], [0], [1], [0, 0, 1, 1], [], []>} : vector<1x64xf32>, vector<64x256xf32>, vector<1x256xf32> -> vector<1x256xf32>
    %249 = arith.addf %228, %248 : vector<1x256xf32>
    %250 = arith.mulf %249, %17 : vector<1x256xf32>
    %251 = math.tanh %250 : vector<1x256xf32>
    %252 = arith.mulf %251, %17 : vector<1x256xf32>
    %253 = arith.addf %252, %20 : vector<1x256xf32>
    %254 = vector.extract_strided_slice %253 {offsets = [0, 0], sizes = [1, 64], strides = [1, 1]} : vector<1x256xf32> to vector<1x64xf32>
    %255 = vector.extract_strided_slice %253 {offsets = [0, 64], sizes = [1, 64], strides = [1, 1]} : vector<1x256xf32> to vector<1x64xf32>
    %256 = vector.extract_strided_slice %253 {offsets = [0, 128], sizes = [1, 64], strides = [1, 1]} : vector<1x256xf32> to vector<1x64xf32>
    %257 = vector.extract_strided_slice %253 {offsets = [0, 192], sizes = [1, 64], strides = [1, 1]} : vector<1x256xf32> to vector<1x64xf32>
    %258 = arith.mulf %255, %220 : vector<1x64xf32>
    %259 = arith.mulf %254, %257 : vector<1x64xf32>
    %260 = arith.addf %258, %259 : vector<1x64xf32>
    %261 = math.tanh %260 : vector<1x64xf32>
    %262 = arith.mulf %256, %261 : vector<1x64xf32>
    %263 = arith.index_cast %c5_i32 : i32 to index
    %c0_94 = arith.constant 0 : index
    %264 = vector.load %arg12[%263, %c0_94] : memref<8x64xf32, #tpu.memory_space<vmem>>, vector<1x64xf32>
    tpu.vector_store %arg12[%263, %c0_94], %262 {strides = array<i32>} : memref<8x64xf32, #tpu.memory_space<vmem>>, vector<1x64xf32>,
    %c6_i32 = arith.constant 6 : i32
    %c0_95 = arith.constant 0 : index
    %c0_96 = arith.constant 0 : index
    %265 = vector.load %arg6[%c0_95, %c0_96] : memref<64x256xf32, #tpu.memory_space<vmem>>, vector<64x256xf32>
    %cst_97 = arith.constant dense<0.000000e+00> : vector<1x256xf32>
    %266 = tpu.matmul %262, %265, %cst_97 {dimension_numbers = #tpu.dot_dimension_numbers<[1], [0], [0], [1], [0, 0, 1, 1], [], []>} : vector<1x64xf32>, vector<64x256xf32>, vector<1x256xf32> -> vector<1x256xf32>
    %c0_98 = arith.constant 0 : index
    %c0_99 = arith.constant 0 : index
    %267 = vector.load %arg7[%c0_98, %c0_99] : memref<1x256xf32, #tpu.memory_space<vmem>>, vector<1x256xf32>
    %268 = arith.addf %266, %267 : vector<1x256xf32>
    %269 = arith.index_cast %c6_i32 : i32 to index
    %c0_100 = arith.constant 0 : index
    %270 = vector.load %arg11[%269, %c0_100] : memref<8x256xf32, #tpu.memory_space<vmem>>, vector<1x256xf32>
    %c0_101 = arith.constant 0 : index
    %c0_102 = arith.constant 0 : index
    %271 = vector.load %arg4[%c0_101, %c0_102] : memref<64x256xf32, #tpu.memory_space<vmem>>, vector<64x256xf32>
    %cst_103 = arith.constant dense<0.000000e+00> : vector<1x256xf32>
    %272 = tpu.matmul %246, %271, %cst_103 {dimension_numbers = #tpu.dot_dimension_numbers<[1], [0], [0], [1], [0, 0, 1, 1], [], []>} : vector<1x64xf32>, vector<64x256xf32>, vector<1x256xf32> -> vector<1x256xf32>
    %273 = arith.addf %270, %272 : vector<1x256xf32>
    %274 = arith.mulf %273, %17 : vector<1x256xf32>
    %275 = math.tanh %274 : vector<1x256xf32>
    %276 = arith.mulf %275, %17 : vector<1x256xf32>
    %277 = arith.addf %276, %20 : vector<1x256xf32>
    %278 = vector.extract_strided_slice %277 {offsets = [0, 0], sizes = [1, 64], strides = [1, 1]} : vector<1x256xf32> to vector<1x64xf32>
    %279 = vector.extract_strided_slice %277 {offsets = [0, 64], sizes = [1, 64], strides = [1, 1]} : vector<1x256xf32> to vector<1x64xf32>
    %280 = vector.extract_strided_slice %277 {offsets = [0, 128], sizes = [1, 64], strides = [1, 1]} : vector<1x256xf32> to vector<1x64xf32>
    %281 = vector.extract_strided_slice %277 {offsets = [0, 192], sizes = [1, 64], strides = [1, 1]} : vector<1x256xf32> to vector<1x64xf32>
    %282 = arith.mulf %279, %244 : vector<1x64xf32>
    %283 = arith.mulf %278, %281 : vector<1x64xf32>
    %284 = arith.addf %282, %283 : vector<1x64xf32>
    %285 = math.tanh %284 : vector<1x64xf32>
    %286 = arith.mulf %280, %285 : vector<1x64xf32>
    %c0_104 = arith.constant 0 : index
    %c0_105 = arith.constant 0 : index
    %287 = vector.load %arg5[%c0_104, %c0_105] : memref<64x256xf32, #tpu.memory_space<vmem>>, vector<64x256xf32>
    %cst_106 = arith.constant dense<0.000000e+00> : vector<1x256xf32>
    %288 = tpu.matmul %286, %287, %cst_106 {dimension_numbers = #tpu.dot_dimension_numbers<[1], [0], [0], [1], [0, 0, 1, 1], [], []>} : vector<1x64xf32>, vector<64x256xf32>, vector<1x256xf32> -> vector<1x256xf32>
    %289 = arith.addf %268, %288 : vector<1x256xf32>
    %290 = arith.mulf %289, %17 : vector<1x256xf32>
    %291 = math.tanh %290 : vector<1x256xf32>
    %292 = arith.mulf %291, %17 : vector<1x256xf32>
    %293 = arith.addf %292, %20 : vector<1x256xf32>
    %294 = vector.extract_strided_slice %293 {offsets = [0, 0], sizes = [1, 64], strides = [1, 1]} : vector<1x256xf32> to vector<1x64xf32>
    %295 = vector.extract_strided_slice %293 {offsets = [0, 64], sizes = [1, 64], strides = [1, 1]} : vector<1x256xf32> to vector<1x64xf32>
    %296 = vector.extract_strided_slice %293 {offsets = [0, 128], sizes = [1, 64], strides = [1, 1]} : vector<1x256xf32> to vector<1x64xf32>
    %297 = vector.extract_strided_slice %293 {offsets = [0, 192], sizes = [1, 64], strides = [1, 1]} : vector<1x256xf32> to vector<1x64xf32>
    %298 = arith.mulf %295, %260 : vector<1x64xf32>
    %299 = arith.mulf %294, %297 : vector<1x64xf32>
    %300 = arith.addf %298, %299 : vector<1x64xf32>
    %301 = math.tanh %300 : vector<1x64xf32>
    %302 = arith.mulf %296, %301 : vector<1x64xf32>
    %303 = arith.index_cast %c6_i32 : i32 to index
    %c0_107 = arith.constant 0 : index
    %304 = vector.load %arg12[%303, %c0_107] : memref<8x64xf32, #tpu.memory_space<vmem>>, vector<1x64xf32>
    tpu.vector_store %arg12[%303, %c0_107], %302 {strides = array<i32>} : memref<8x64xf32, #tpu.memory_space<vmem>>, vector<1x64xf32>,
    %c7_i32 = arith.constant 7 : i32
    %c0_108 = arith.constant 0 : index
    %c0_109 = arith.constant 0 : index
    %305 = vector.load %arg6[%c0_108, %c0_109] : memref<64x256xf32, #tpu.memory_space<vmem>>, vector<64x256xf32>
    %cst_110 = arith.constant dense<0.000000e+00> : vector<1x256xf32>
    %306 = tpu.matmul %302, %305, %cst_110 {dimension_numbers = #tpu.dot_dimension_numbers<[1], [0], [0], [1], [0, 0, 1, 1], [], []>} : vector<1x64xf32>, vector<64x256xf32>, vector<1x256xf32> -> vector<1x256xf32>
    %c0_111 = arith.constant 0 : index
    %c0_112 = arith.constant 0 : index
    %307 = vector.load %arg7[%c0_111, %c0_112] : memref<1x256xf32, #tpu.memory_space<vmem>>, vector<1x256xf32>
    %308 = arith.addf %306, %307 : vector<1x256xf32>
    %309 = arith.index_cast %c7_i32 : i32 to index
    %c0_113 = arith.constant 0 : index
    %310 = vector.load %arg11[%309, %c0_113] : memref<8x256xf32, #tpu.memory_space<vmem>>, vector<1x256xf32>
    %c0_114 = arith.constant 0 : index
    %c0_115 = arith.constant 0 : index
    %311 = vector.load %arg4[%c0_114, %c0_115] : memref<64x256xf32, #tpu.memory_space<vmem>>, vector<64x256xf32>
    %cst_116 = arith.constant dense<0.000000e+00> : vector<1x256xf32>
    %312 = tpu.matmul %286, %311, %cst_116 {dimension_numbers = #tpu.dot_dimension_numbers<[1], [0], [0], [1], [0, 0, 1, 1], [], []>} : vector<1x64xf32>, vector<64x256xf32>, vector<1x256xf32> -> vector<1x256xf32>
    %313 = arith.addf %310, %312 : vector<1x256xf32>
    %314 = arith.mulf %313, %17 : vector<1x256xf32>
    %315 = math.tanh %314 : vector<1x256xf32>
    %316 = arith.mulf %315, %17 : vector<1x256xf32>
    %317 = arith.addf %316, %20 : vector<1x256xf32>
    %318 = vector.extract_strided_slice %317 {offsets = [0, 0], sizes = [1, 64], strides = [1, 1]} : vector<1x256xf32> to vector<1x64xf32>
    %319 = vector.extract_strided_slice %317 {offsets = [0, 64], sizes = [1, 64], strides = [1, 1]} : vector<1x256xf32> to vector<1x64xf32>
    %320 = vector.extract_strided_slice %317 {offsets = [0, 128], sizes = [1, 64], strides = [1, 1]} : vector<1x256xf32> to vector<1x64xf32>
    %321 = vector.extract_strided_slice %317 {offsets = [0, 192], sizes = [1, 64], strides = [1, 1]} : vector<1x256xf32> to vector<1x64xf32>
    %322 = arith.mulf %319, %284 : vector<1x64xf32>
    %323 = arith.mulf %318, %321 : vector<1x64xf32>
    %324 = arith.addf %322, %323 : vector<1x64xf32>
    %325 = math.tanh %324 : vector<1x64xf32>
    %326 = arith.mulf %320, %325 : vector<1x64xf32>
    %c0_117 = arith.constant 0 : index
    %c0_118 = arith.constant 0 : index
    %327 = vector.load %arg5[%c0_117, %c0_118] : memref<64x256xf32, #tpu.memory_space<vmem>>, vector<64x256xf32>
    %cst_119 = arith.constant dense<0.000000e+00> : vector<1x256xf32>
    %328 = tpu.matmul %326, %327, %cst_119 {dimension_numbers = #tpu.dot_dimension_numbers<[1], [0], [0], [1], [0, 0, 1, 1], [], []>} : vector<1x64xf32>, vector<64x256xf32>, vector<1x256xf32> -> vector<1x256xf32>
    %329 = arith.addf %308, %328 : vector<1x256xf32>
    %330 = arith.mulf %329, %17 : vector<1x256xf32>
    %331 = math.tanh %330 : vector<1x256xf32>
    %332 = arith.mulf %331, %17 : vector<1x256xf32>
    %333 = arith.addf %332, %20 : vector<1x256xf32>
    %334 = vector.extract_strided_slice %333 {offsets = [0, 0], sizes = [1, 64], strides = [1, 1]} : vector<1x256xf32> to vector<1x64xf32>
    %335 = vector.extract_strided_slice %333 {offsets = [0, 64], sizes = [1, 64], strides = [1, 1]} : vector<1x256xf32> to vector<1x64xf32>
    %336 = vector.extract_strided_slice %333 {offsets = [0, 128], sizes = [1, 64], strides = [1, 1]} : vector<1x256xf32> to vector<1x64xf32>
    %337 = vector.extract_strided_slice %333 {offsets = [0, 192], sizes = [1, 64], strides = [1, 1]} : vector<1x256xf32> to vector<1x64xf32>
    %338 = arith.mulf %335, %300 : vector<1x64xf32>
    %339 = arith.mulf %334, %337 : vector<1x64xf32>
    %340 = arith.addf %338, %339 : vector<1x64xf32>
    %341 = math.tanh %340 : vector<1x64xf32>
    %342 = arith.mulf %336, %341 : vector<1x64xf32>
    %343 = arith.index_cast %c7_i32 : i32 to index
    %c0_120 = arith.constant 0 : index
    %344 = vector.load %arg12[%343, %c0_120] : memref<8x64xf32, #tpu.memory_space<vmem>>, vector<1x64xf32>
    tpu.vector_store %arg12[%343, %c0_120], %342 {strides = array<i32>} : memref<8x64xf32, #tpu.memory_space<vmem>>, vector<1x64xf32>,
    %c8_i32 = arith.constant 8 : i32
    %c0_121 = arith.constant 0 : index
    %c0_122 = arith.constant 0 : index
    %345 = vector.load %arg13[%c0_121, %c0_122] : memref<4x64xf32, #tpu.memory_space<vmem>>, vector<1x64xf32>
    tpu.vector_store %arg13[%c0_121, %c0_122], %326 {strides = array<i32>} : memref<4x64xf32, #tpu.memory_space<vmem>>, vector<1x64xf32>,
    %c1_123 = arith.constant 1 : index
    %c0_124 = arith.constant 0 : index
    %346 = vector.load %arg13[%c1_123, %c0_124] : memref<4x64xf32, #tpu.memory_space<vmem>>, vector<1x64xf32>
    tpu.vector_store %arg13[%c1_123, %c0_124], %324 {strides = array<i32>} : memref<4x64xf32, #tpu.memory_space<vmem>>, vector<1x64xf32>,
    %c2_125 = arith.constant 2 : index
    %c0_126 = arith.constant 0 : index
    %347 = vector.load %arg13[%c2_125, %c0_126] : memref<4x64xf32, #tpu.memory_space<vmem>>, vector<1x64xf32>
    tpu.vector_store %arg13[%c2_125, %c0_126], %342 {strides = array<i32>} : memref<4x64xf32, #tpu.memory_space<vmem>>, vector<1x64xf32>,
    %c3_127 = arith.constant 3 : index
    %c0_128 = arith.constant 0 : index
    %348 = vector.load %arg13[%c3_127, %c0_128] : memref<4x64xf32, #tpu.memory_space<vmem>>, vector<1x64xf32>
    tpu.vector_store %arg13[%c3_127, %c0_128], %340 {strides = array<i32>} : memref<4x64xf32, #tpu.memory_space<vmem>>, vector<1x64xf32>,
    %c0_129 = arith.constant 0 : index
    %c0_130 = arith.constant 0 : index
    %349 = vector.load %arg12[%c0_129, %c0_130] : memref<8x64xf32, #tpu.memory_space<vmem>>, vector<8x64xf32>
    %c0_131 = arith.constant 0 : index
    %c0_132 = arith.constant 0 : index
    %350 = vector.load %arg8[%c0_131, %c0_132] : memref<64x128xf32, #tpu.memory_space<vmem>>, vector<64x128xf32>
    %cst_133 = arith.constant dense<0.000000e+00> : vector<8x128xf32>
    %351 = tpu.matmul %349, %350, %cst_133 {dimension_numbers = #tpu.dot_dimension_numbers<[1], [0], [0], [1], [0, 0, 1, 1], [], []>} : vector<8x64xf32>, vector<64x128xf32>, vector<8x128xf32> -> vector<8x128xf32>
    %c0_134 = arith.constant 0 : index
    %c0_135 = arith.constant 0 : index
    %352 = vector.load %arg9[%c0_134, %c0_135] : memref<1x128xf32, #tpu.memory_space<vmem>>, vector<1x128xf32>
    %353 = vector.broadcast %352 : vector<1x128xf32> to vector<8x128xf32>
    %354 = arith.addf %351, %353 : vector<8x128xf32>
    %c0_136 = arith.constant 0 : index
    %c0_137 = arith.constant 0 : index
    %355 = vector.load %arg10[%c0_136, %c0_137] : memref<8x128xf32, #tpu.memory_space<vmem>>, vector<8x128xf32>
    tpu.vector_store %arg10[%c0_136, %c0_137], %354 {strides = array<i32>} : memref<8x128xf32, #tpu.memory_space<vmem>>, vector<8x128xf32>,
    return
  }
  func.func @transform_0(%arg0: i32) -> (i32, i32) {
    %c0_i32 = arith.constant 0 : i32
    %c0_i32_0 = arith.constant 0 : i32
    return %arg0, %c0_i32 : i32, i32
  }
  func.func @transform_1(%arg0: i32) -> (i32, i32) {
    %c0_i32 = arith.constant 0 : i32
    %c0_i32_0 = arith.constant 0 : i32
    %c0_i32_1 = arith.constant 0 : i32
    return %c0_i32, %c0_i32_0 : i32, i32
  }
  func.func @transform_2(%arg0: i32) -> (i32, i32) {
    %c0_i32 = arith.constant 0 : i32
    %c0_i32_0 = arith.constant 0 : i32
    %c0_i32_1 = arith.constant 0 : i32
    return %c0_i32, %c0_i32_0 : i32, i32
  }
  func.func @transform_3(%arg0: i32) -> (i32, i32) {
    %c0_i32 = arith.constant 0 : i32
    %c0_i32_0 = arith.constant 0 : i32
    %c0_i32_1 = arith.constant 0 : i32
    return %c0_i32, %c0_i32_0 : i32, i32
  }
  func.func @transform_4(%arg0: i32) -> (i32, i32) {
    %c0_i32 = arith.constant 0 : i32
    %c0_i32_0 = arith.constant 0 : i32
    %c0_i32_1 = arith.constant 0 : i32
    return %c0_i32, %c0_i32_0 : i32, i32
  }
  func.func @transform_5(%arg0: i32) -> (i32, i32) {
    %c0_i32 = arith.constant 0 : i32
    %c0_i32_0 = arith.constant 0 : i32
    %c0_i32_1 = arith.constant 0 : i32
    return %c0_i32, %c0_i32_0 : i32, i32
  }
  func.func @transform_6(%arg0: i32) -> (i32, i32) {
    %c0_i32 = arith.constant 0 : i32
    %c0_i32_0 = arith.constant 0 : i32
    %c0_i32_1 = arith.constant 0 : i32
    return %c0_i32, %c0_i32_0 : i32, i32
  }
  func.func @transform_7(%arg0: i32) -> (i32, i32) {
    %c0_i32 = arith.constant 0 : i32
    %c0_i32_0 = arith.constant 0 : i32
    %c0_i32_1 = arith.constant 0 : i32
    return %c0_i32, %c0_i32_0 : i32, i32
  }
  func.func @transform_8(%arg0: i32) -> (i32, i32) {
    %c0_i32 = arith.constant 0 : i32
    %c0_i32_0 = arith.constant 0 : i32
    %c0_i32_1 = arith.constant 0 : i32
    return %c0_i32, %c0_i32_0 : i32, i32
  }
  func.func @transform_9(%arg0: i32) -> (i32, i32) {
    %c0_i32 = arith.constant 0 : i32
    %c0_i32_0 = arith.constant 0 : i32
    return %arg0, %c0_i32 : i32, i32
  }
}

</mosaic_0001>

<bundles_post_ra>
// kernel: tpu_custom_call.1
= control target key start
LH: loop header
LB: loop body
LE: loop exit
PB: predicated region body
PF: predicated region fallthrough
CT: control target
= control target key end

     0   :  { %14 = vsyncpa [#allocation6], 0  ;;  %s4403_s0 = inlined_call_operand.vmem [shape: f32[8,1], index: 0, kind: input, shape index: {}]   ;;  %s4404_s1 = inlined_call_operand.vmem [shape: f32[1,256], index: 1, kind: input, shape index: {}]   ;;  %s4405_s2 = inlined_call_operand.vmem [shape: f32[1,256], index: 2, kind: input, shape index: {}]   ;;  %s4406_s3 = inlined_call_operand.hbm [shape: f32[64,256], index: 3, kind: input, shape index: {}]   ;;  %s4407_s4 = inlined_call_operand.hbm [shape: f32[64,256], index: 4, kind: input, shape index: {}]   ;;  %s4408_s5 = inlined_call_operand.hbm [shape: f32[64,256], index: 5, kind: input, shape index: {}]   ;;  %s4409_s6 = inlined_call_operand.vmem [shape: f32[1,256], index: 6, kind: input, shape index: {}]   ;;  %s4410_s7 = inlined_call_operand.hbm [shape: f32[64,128], index: 7, kind: input, shape index: {}]   ;;  %s4411_s8 = inlined_call_operand.vmem [shape: f32[1,128], index: 8, kind: input, shape index: {}]   ;;  %s4412_s9 = inlined_call_operand.hbm [shape: f32[8,128], index: 9, kind: output, shape index: {}]  }
   0x1   :  { %15 = vsyncpa [#allocation9], 0 }
   0x2   :  { %16 = vsyncpa [#allocation12], 0 }
   0x3   :  { %17 = vsyncpa [#allocation7], 0  ;;  %s3404_s30 = smov [#allocation8]   ;;  %s3405_s11 = smov [#allocation5]  }
   0x4   :  { %s41_s10 = sshll.u32 %s3404_s30, 4  ;;  %s29_s12 = sshll.u32 %s3405_s11, 4  ;;  %s42_s10 = int_to_ptr.vmem [resolvable:$true] %s41_s10  ;;  %s30_s12 = int_to_ptr.vmem [resolvable:$true] %s29_s12 }
   0x5   :  { %s3304_s13 = scalar_lea.vmem %s42_s10, 2048  ;;  %p3309_p1 = scmp.lt.s32.totalorder %s42_s10, %s42_s10 }
   0x6   :  { %p3305_p0 = scmp.ne.s32.totalorder %s42_s10, %s3304_s13  ;;  %p3310_p2 = scmp.lt.s32.totalorder %s3304_s13, %s3304_s13 }
   0x8   :  { %p3311_p3 = por %p3310_p2, %p3309_p1 }
   0xa   :  { %p3312_p4 = pnand %p3311_p3, %p3305_p0 }
   0xc   :  { %3315 = shalt.err (!%p3312_p4)
}
   0xd   :  { %s3406_s14 = smov 256   ;;  %s3407_s15 = smov 16  }
   0xe   :  { %47 = dma.hbm_to_vmem [thread:$0]  %s4407_s4, 2048, %s42_s10, [#allocation9], %s3406_s14, %s3406_s14, %s3407_s15  }
   0xf   :  { %s3324_s18 = scalar_lea.vmem %s30_s12, 2048  ;;  %p3329_p6 = scmp.lt.s32.totalorder %s30_s12, %s30_s12 }
  0x10   :  { %p3325_p5 = scmp.ne.s32.totalorder %s30_s12, %s3324_s18  ;;  %p3330_p7 = scmp.lt.s32.totalorder %s3324_s18, %s3324_s18 }
  0x12   :  { %p3331_p8 = por %p3330_p7, %p3329_p6 }
  0x14   :  { %p3332_p9 = pnand %p3331_p8, %p3325_p5 }
  0x16   :  { %3335 = shalt.err (!%p3332_p9)
}
  0x17   :  { %35 = dma.hbm_to_vmem [thread:$0]  %s4406_s3, 2048, %s30_s12, [#allocation6], %s3406_s14, %s3406_s14, %s3407_s15  }
  0x18   :  { %s3408_s21 = smov [#allocation10]   ;;  %s3409_s23 = smov [#allocation11]  }
  0x19   :  { %s53_s22 = sshll.u32 %s3408_s21, 4  ;;  %s67_s24 = sshll.u32 %s3409_s23, 4  ;;  %s54_s22 = int_to_ptr.vmem [resolvable:$true] %s53_s22  ;;  %s68_s24 = int_to_ptr.vmem [resolvable:$true] %s67_s24 }
  0x1a   :  { %s3344_s25 = scalar_lea.vmem %s54_s22, 2048  ;;  %p3349_p11 = scmp.lt.s32.totalorder %s54_s22, %s54_s22 }
  0x1b   :  { %p3345_p10 = scmp.ne.s32.totalorder %s54_s22, %s3344_s25  ;;  %p3350_p12 = scmp.lt.s32.totalorder %s3344_s25, %s3344_s25 }
  0x1d   :  { %p3351_p13 = por %p3350_p12, %p3349_p11 }
  0x1f   :  { %p3352_p0 = pnand %p3351_p13, %p3345_p10 }
  0x21   :  { %3355 = shalt.err (!%p3352_p0)
}
  0x22   :  { %59 = dma.hbm_to_vmem [thread:$0]  %s4408_s5, 2048, %s54_s22, [#allocation9], %s3406_s14, %s3406_s14, %s3407_s15  }
  0x23   :  { %s3364_s27 = scalar_lea.vmem %s68_s24, 1024  ;;  %p3369_p2 = scmp.lt.s32.totalorder %s68_s24, %s68_s24 }
  0x24   :  { %p3365_p1 = scmp.ne.s32.totalorder %s68_s24, %s3364_s27  ;;  %p3370_p3 = scmp.lt.s32.totalorder %s3364_s27, %s3364_s27 }
  0x26   :  { %p3371_p4 = por %p3370_p3, %p3369_p2 }
  0x28   :  { %p3372_p5 = pnand %p3371_p4, %p3365_p1 }
  0x2a   :  { %3375 = shalt.err (!%p3372_p5)
}
  0x2b   :  { %s3410_s3 = smov 128   ;;  %s3411_s28 = smov 8  }
  0x2c   :  { %73 = dma.hbm_to_vmem [thread:$0]  %s4410_s7, 1024, %s68_s24, [#allocation12], %s3410_s3, %s3410_s3, %s3411_s28  }
  0x2d   :  { %3396 = dma.done.wait [#allocation6], 2048  }
  0x2e   :  { %3397 = vsyncadd [#allocation6], 4294965248 }
  0x2f   :  { %3398 = dma.done.wait [#allocation9], 4096  }
  0x30   :  { %3399 = vsyncadd [#allocation9], 4294963200 }
  0x31   :  { %3400 = dma.done.wait [#allocation12], 1024  }
  0x32   :  { %3401 = vsyncadd [#allocation12], 4294966272  ;;  %vm92_vm0 = vcmask 519168   ;;  %v4413_v0 = vmov 0.0   ;;  %v3413_v1 = vmov 0   ;;  %v102_v2 = vlaneseq  ;;  %v3486_v7 = vld [vmem:[#allocation5 + $0x78] sm:$0xff] }
  0x33   :  { %330 = vmatprep.mubr.f32.mxu1 %v4413_v0  ;;  %93 = vst.msk [vmem:[#allocation4] sm:$0xf] %vm92_vm0, %v4413_v0  ;;  %3215 = vset.pattern.permute.xlu0 %v3413_v1  ;;  %v3414_v3 = vmov 1966171168   ;;  %4442 = vst [vmem:[#allocation18_spill] sm:$0xff] %v3486_v7  ;;  %v3488_v8 = vld [vmem:[#allocation5 + $0x70] sm:$0xff] }
  0x34   :  { %v341_v4 = vunpack.c.l.s4 %v3414_v3  ;;  %239 = vmatprep.mubr.f32.mxu0 %v4413_v0  ;;  %v103_v5 = vshrl.u32 %v102_v2, 7  ;;  %v3490_v9 = vld [vmem:[#allocation5 + $0x68] sm:$0xff]  ;;  %282 = vmatprep.subr.mxu1 %v3486_v7  ;;  %v3493_v10 = vld [vmem:[#allocation5 + $0x60] sm:$0xff]  ;;  %v3496_v11 = vld [vmem:[#allocation5 + $0x58] sm:$0xff]  ;;  %vm171_vm1 = vcmask 523264   ;;  %v131_v41 = vand.u32 127, %v102_v2 }
  0x35   :  { %283 = vmatpush1.msra.mxu1 %v3488_v8  ;;  %v3499_v12 = vld [vmem:[#allocation5 + $0x50] sm:$0xff]  ;;  %v3504_v14 = vld [vmem:[#allocation5 + $0x48] sm:$0xff]  ;;  %v3507_v15 = vld [vmem:[#allocation5 + $0x40] sm:$0xff]  ;;  %v3416_v43 = vmov 1.0   ;;  %v3417_v45 = vmov 0.5   ;;  %vm555_vm3 = vcmask 516096  }
  0x36   :  { %v342_v6 = vunpack.c.0.s8 %v341_v4  ;;  %284 = vmatprep.subr.mxu1 %v3490_v9  ;;  %v94_v16 = vld [vmem:[%s4403_s0] sm:$0xff]  ;;  %v3513_v17 = vld [vmem:[#allocation5 + $0x38] sm:$0xff]  ;;  %v3516_v19 = vld [vmem:[#allocation5 + $0x30] sm:$0xff]  ;;  %s3415_s0 = smov 64   ;;  %v3543_v28 = vsub.s32 0, %v103_v5  ;;  %v3545_v29 = vsub.s32 1, %v103_v5 }
  0x37   :  { %285 = vmatpush1.msra.mxu1 %v3493_v10  ;;  %98 = vperm.xlu0 %3215, %v94_v16   ;;  %v3520_v21 = vld [vmem:[#allocation5 + $0x28] sm:$0xff]  ;;  %v3523_v22 = vld [vmem:[#allocation5 + $0x20] sm:$0xff]  ;;  %v3527_v23 = vld [vmem:[#allocation5 + $0x18] sm:$0xff]  ;;  %v132_v42 = vadd.s32 128, %v131_v41  ;;  %vm3418_vm4 = vmmov 0   ;;  %s3419_s3 = smov [#allocation13]  }
  0x38   :  { %v3501_v13 = vsub.s32 %v342_v6, %v103_v5  ;;  %286 = vmatprep.subr.mxu1 %v3496_v11  ;;  %v3530_v24 = vld [vmem:[#allocation5 + $0x10] sm:$0xff]  ;;  %v3533_v25 = vld [vmem:[#allocation5 + $0x8] sm:$0xff]  ;;  %v3536_v26 = vld [vmem:[#allocation5] sm:$0xff]  ;;  %4443 = vst [vmem:[#allocation19_spill] sm:$0xff] %v3543_v28  ;;  %s3133_s28 = sshll.u32 %s3419_s3, 4  ;;  %s3134_s28 = int_to_ptr.vmem [resolvable:$true] %s3133_s28 }
  0x39   :  { %287 = vmatpush1.msra.mxu1 %v3499_v12  ;;  %4444 = vst [vmem:[#allocation20_spill] sm:$0xff] %v3545_v29  ;;  %v95_v30 = vld [vmem:[%s4404_s1] sm:$0x3]  ;;  %vm134_vm2 = vcmp.lt.s32.totalorder %v132_v42, 192  ;;  %v3586_v4 = vld [vmem:[#allocation10 + $0x78] sm:$0xff]  ;;  %v3588_v5 = vld [vmem:[#allocation10 + $0x70] sm:$0xff]  ;;  %p3381_p7 = scmp.lt.s32.totalorder %s3134_s28, %s3134_s28 }
  0x3a   :  { %v3146_v18 = vld.sshfl [vmem:[#allocation4 + $0x1] sm:$0x1 pattern:$0x75316420]  ;;  %288 = vmatprep.subr.mxu1 %v3504_v14  ;;  %v139_v27 = vld [vmem:[#allocation4] sm:$0x1]  ;;  %v105_v32 = vrot.slane %v95_v30, %v3543_v28  ;;  %v109_v33 = vrot.slane %v95_v30, %v3545_v29  ;;  %191 = vmatprep.subr.mxu0 %v3586_v4 }
  0x3b   :  { %v410_v20 = vrot.slane %v3146_v18, %v3501_v13  ;;  %289 = vmatpush1.msra.mxu1 %v3507_v15  ;;  %v114_v31 = vld [vmem:[%s4405_s2] sm:$0x3]  ;;  %v3559_v44 = vsel %vm134_vm2, 0.5, %v3416_v43  ;;  %v3571_v57 = vsel %vm134_vm2, 0.5, %v4413_v0  ;;  %v3590_v6 = vld [vmem:[#allocation10 + $0x68] sm:$0xff]  ;;  %192 = vmatpush1.msra.mxu0 %v3588_v5  ;;  %v3597_v18 = vld [vmem:[#allocation10 + $0x58] sm:$0xff] }
  0x3c   :  { %290 = vmatprep.subr.mxu1 %v3513_v17  ;;  %v119_v34 = vrot.slane %v114_v31, %v3543_v28  ;;  %v123_v35 = vrot.slane %v114_v31, %v3545_v29  ;;  %v358_v46 = vcombine.low %v3417_v45, %v3559_v44  ;;  %v379_v58 = vcombine.low %v3417_v45, %v3571_v57  ;;  %v3593_v16 = vld [vmem:[#allocation10 + $0x60] sm:$0xff]  ;;  %v3613_v31 = vld [vmem:[#allocation10 + $0x38] sm:$0xff]  ;;  %v3649_v41 = vld [vmem:[#allocation8 + $0x70] sm:$0xff]  ;;  %s3376_s29 = scalar_lea.vmem %s3134_s28, 128 }
  0x3d   :  { %411 = vrot.lane.b32.xlu1 %v410_v20, %s3415_s0  ;;  %291 = vmatpush1.msra.mxu1 %v3516_v19  ;;  %v3601_v20 = vld [vmem:[#allocation10 + $0x50] sm:$0xff]  ;;  %v3609_v30 = vld [vmem:[#allocation10 + $0x40] sm:$0xff]  ;;  %v3653_v42 = vld [vmem:[#allocation8 + $0x68] sm:$0xff]  ;;  %p3377_p6 = scmp.ne.s32.totalorder %s3134_s28, %s3376_s29  ;;  %p3382_p8 = scmp.lt.s32.totalorder %s3376_s29, %s3376_s29 }
  0x3e   :  { %292 = vmatprep.subr.mxu1 %v3520_v21  ;;  %v365_v50 = vrot.slane %v358_v46, %v3501_v13  ;;  %v386_v59 = vrot.slane %v379_v58, %v3501_v13  ;;  %193 = vmatprep.subr.mxu0 %v3590_v6  ;;  %v3658_v43 = vld [vmem:[#allocation8 + $0x60] sm:$0xff]  ;;  %v3661_v45 = vld [vmem:[#allocation8 + $0x58] sm:$0xff]  ;;  %v3665_v46 = vld [vmem:[#allocation8 + $0x50] sm:$0xff] }
  0x3f   :  { %293 = vmatpush1.msra.mxu1 %v3523_v22  ;;  %194 = vmatpush1.msra.mxu0 %v3593_v16  ;;  %p3383_p9 = por %p3382_p8, %p3381_p7 }
  0x40   :  { %294 = vmatprep.subr.mxu1 %v3527_v23  ;;  %v3566_v54 = vrot.slane %v365_v50, %v3501_v13  ;;  %v3576_v60 = vrot.slane %v386_v59, %v3501_v13  ;;  %195 = vmatprep.subr.mxu0 %v3597_v18  ;;  %v3678_v50 = vld [vmem:[#allocation8 + $0x30] sm:$0xff] }
  0x41   :  { %295 = vmatpush1.msra.mxu1 %v3530_v24  ;;  %196 = vmatpush1.msra.mxu0 %v3601_v20  ;;  %p3384_p10 = pnand %p3383_p9, %p3377_p6 }
  0x42   :  { %296 = vmatprep.subr.mxu1 %v3533_v25 }
  0x43   :  { %297 = vmatpush1.msra.mxu1 %v3536_v26 }
  0x44   :  { %3145 = vmatmul.mubr.msk.f32.vlgmr.msra.gmra.mxu1 %vm171_vm1, %v139_v27  ;;  %604 = vmatprep.subr.mxu1 %v3586_v4  ;;  %v3605_v27 = vld [vmem:[#allocation10 + $0x48] sm:$0xff] }
  0x45   :  { %652 = vmatprep.mubr.f32.mxu1 %v4413_v0  ;;  %605 = vmatpush1.msra.mxu1 %v3588_v5 }
  0x46   :  { %606 = vmatprep.subr.mxu1 %v3590_v6  ;;  %197 = vmatprep.subr.mxu0 %v3605_v27 }
  0x47   :  { %607 = vmatpush1.msra.mxu1 %v3593_v16  ;;  %198 = vmatpush1.msra.mxu0 %v3609_v30 }
  0x48   :  { %608 = vmatprep.subr.mxu1 %v3597_v18  ;;  %199 = vmatprep.subr.mxu0 %v3613_v31 }
  0x49   :  { %609 = vmatpush1.msra.mxu1 %v3601_v20 }
  0x4a   :  { %610 = vmatprep.subr.mxu1 %v3605_v27 }
  0x4b   :  { %611 = vmatpush1.msra.mxu1 %v3609_v30 }
  0x4c   :  { %612 = vmatprep.subr.mxu1 %v3613_v31 }
  0xaf   :  { %v412_v58 = vpop.permute.xlu1 %411 }
  0xb2   :  { %v99_v36 = vpop.permute.xlu0 %98 }
  0xb3   :  { %v112_v37 = vmul.f32 %v105_v32, %v99_v36  ;;  %v113_v38 = vmul.f32 %v109_v33, %v99_v36  ;;  %v3617_v32 = vld [vmem:[#allocation10 + $0x30] sm:$0xff]  ;;  %v3621_v33 = vld [vmem:[#allocation10 + $0x28] sm:$0xff] }
  0xb4   :  { %4445 = vst [vmem:[#allocation21_spill] sm:$0xff] %v3621_v33  ;;  %200 = vmatpush1.msra.mxu0 %v3617_v32  ;;  %613 = vmatpush1.msra.mxu1 %v3617_v32  ;;  %v3633_v36 = vld [vmem:[#allocation10 + $0x10] sm:$0xff] }
  0xb5   :  { %v126_v39 = vadd.f32 %v119_v34, %v112_v37  ;;  %v127_v40 = vadd.f32 %v123_v35, %v113_v38  ;;  %v3625_v34 = vld [vmem:[#allocation10 + $0x20] sm:$0xff]  ;;  %v3629_v35 = vld [vmem:[#allocation10 + $0x18] sm:$0xff]  ;;  %201 = vmatprep.subr.mxu0 %v3621_v33  ;;  %4448 = vst [vmem:[#allocation24_spill] sm:$0xff] %v3633_v36  ;;  %614 = vmatprep.subr.mxu1 %v3621_v33  ;;  %v3637_v37 = vld [vmem:[#allocation10 + $0x8] sm:$0xff] }
  0xb6   :  { %4446 = vst [vmem:[#allocation22_spill] sm:$0xff] %v3625_v34  ;;  %4447 = vst [vmem:[#allocation23_spill] sm:$0xff] %v3629_v35  ;;  %202 = vmatpush1.msra.mxu0 %v3625_v34  ;;  %615 = vmatpush1.msra.mxu1 %v3625_v34  ;;  %v3641_v38 = vld [vmem:[#allocation10] sm:$0xff] }
  0xb7   :  { %128 = vst [vmem:[#allocation2] sm:$0xff] %v126_v39  ;;  %129 = vst [vmem:[#allocation2 + $0x8] sm:$0xff] %v127_v40  ;;  %203 = vmatprep.subr.mxu0 %v3629_v35  ;;  %616 = vmatprep.subr.mxu1 %v3629_v35  ;;  %v141_v39 = vld [vmem:[#allocation4 + $0x2] sm:$0x1] }
  0xb8   :  { %4449 = vst [vmem:[#allocation25_spill] sm:$0xff] %v3637_v37  ;;  %4450 = vst [vmem:[#allocation26_spill] sm:$0xff] %v3641_v38  ;;  %204 = vmatpush1.msra.mxu0 %v3633_v36  ;;  %v3645_v40 = vld [vmem:[#allocation8 + $0x78] sm:$0xff]  ;;  %617 = vmatpush1.msra.mxu1 %v3633_v36 }
  0xb9   :  { %4451 = vst [vmem:[#allocation27_spill] sm:$0xff] %v3645_v40  ;;  %205 = vmatprep.subr.mxu0 %v3637_v37  ;;  %618 = vmatprep.subr.mxu1 %v3637_v37 }
  0xba   :  { %206 = vmatpush1.msra.mxu0 %v3641_v38  ;;  %619 = vmatpush1.msra.mxu1 %v3641_v38 }
  0xbb   :  { %3144 = vmatmul.mubr.msk.f32.vlgmr.msra.gmra.mxu0 %vm171_vm1, %v141_v39  ;;  %469 = vmatprep.subr.mxu0 %v3645_v40 }
  0xbc   :  { %470 = vmatpush1.msra.mxu0 %v3649_v41  ;;  %517 = vmatprep.mubr.f32.mxu0 %v4413_v0 }
  0xbd   :  { %471 = vmatprep.subr.mxu0 %v3653_v42  ;;  %826 = vmatprep.subr.mxu1 %v3645_v40 }
  0xbe   :  { %v246_v52 = vld [vmem:[#allocation2] ss:$8 sm:$0x3]  ;;  %472 = vmatpush1.msra.mxu0 %v3658_v43 }
  0xbf   :  { %473 = vmatprep.subr.mxu0 %v3661_v45 }
  0xc0   :  { %474 = vmatpush1.msra.mxu0 %v3665_v46 }
 0x104   :  { %v332_v47 = vpop.f32.mrf.mxu1 }
 0x106   :  { %v334_v48 = vpop.f32.mrf.mxu1 }
 0x107   :  { %v339_v49 = vcombine.low %v332_v47, %v334_v48  ;;  %v3669_v47 = vld [vmem:[#allocation8 + $0x48] sm:$0xff]  ;;  %v3672_v48 = vld [vmem:[#allocation8 + $0x40] sm:$0xff] }
 0x108   :  { %475 = vmatprep.subr.mxu0 %v3669_v47 }
 0x109   :  { %v346_v51 = vrot.slane %v339_v49, %v3501_v13  ;;  %v3675_v49 = vld [vmem:[#allocation8 + $0x38] sm:$0xff]  ;;  %476 = vmatpush1.msra.mxu0 %v3672_v48 }
 0x10a   :  { %477 = vmatprep.subr.mxu0 %v3675_v49 }
 0x10b   :  { %v353_v53 = vrot.slane %v346_v51, %v3501_v13  ;;  %v3681_v51 = vld [vmem:[#allocation8 + $0x28] sm:$0xff]  ;;  %478 = vmatpush1.msra.mxu0 %v3678_v50 }
 0x10c   :  { %479 = vmatprep.subr.mxu0 %v3681_v51 }
 0x10d   :  { %v355_v55 = vadd.f32 %v353_v53, %v246_v52  ;;  %v3684_v52 = vld [vmem:[#allocation8 + $0x20] sm:$0xff]  ;;  %v3687_v53 = vld [vmem:[#allocation8 + $0x18] sm:$0xff] }
 0x10e   :  { %480 = vmatpush1.msra.mxu0 %v3684_v52 }
 0x10f   :  { %v374_v56 = vmul.f32 %v3566_v54, %v355_v55  ;;  %v3690_v55 = vld [vmem:[#allocation8 + $0x10] sm:$0xff]  ;;  %481 = vmatprep.subr.mxu0 %v3687_v53 }
 0x110   :  { %482 = vmatpush1.msra.mxu0 %v3690_v55 }
 0x111   :  { %3216 = vtanh.f32 %v374_v56  ;;  %v3693_v56 = vld [vmem:[#allocation8 + $0x8] sm:$0xff] }
 0x112   :  { %4452 = vst [vmem:[#allocation28_spill] sm:$0xff] %v3693_v56  ;;  %483 = vmatprep.subr.mxu0 %v3693_v56 }
 0x11e   :  { %v3217_v61 = vpop.eup %3216 }
 0x11f   :  { %v376_v62 = vmul.f32 %v3217_v61, %v3566_v54 }
 0x121   :  { %v3580_v63 = vadd.f32 %v3576_v60, %v376_v62 }
 0x123   :  { %416 = vrot.lane.b32.xlu0 %v3580_v63, %s3415_s0  ;;  %v414_v59 = vmul.f32 %v412_v58, %v3580_v63 }
 0x17b   :  { %v241_v58 = vpop.f32.mrf.mxu0 }
 0x195   :  { %v417_v1 = vpop.permute.xlu0 %416 }
 0x196   :  { %v418_v2 = vrot.slane %v417_v1, 1  ;;  %v3702_v1 = vld [vmem:[#allocation8] sm:$0xff] }
 0x197   :  { %484 = vmatpush1.msra.mxu0 %v3702_v1 }
 0x198   :  { %v420_v3 = vmul.f32 %v418_v2, %v3580_v63  ;;  %693 = vmatprep.subr.mxu0 %v3486_v7  ;;  %v4453_v7 = vmov 0.0  }
 0x19a   :  { %422 = vrot.lane.b32.xlu1 %v420_v3, %s3415_s0  ;;  %v159_v3 = vld [vmem:[%s4409_s6] sm:$0x3] }
 0x19b   :  { %v164_v39 = vrot.slane %v159_v3, %v3543_v28 }
 0x20c   :  { %v423_v61 = vpop.permute.xlu1 %422 }
 0x20d   :  { %v3699_v62 = vadd.f32 %v423_v61, %v414_v59  ;;  %v242_v59 = vadd.f32 %v241_v58, %v164_v39  ;;  %v427_v61 = vrot.slane %v3580_v63, 1  ;;  %v243_v63 = vpop.f32.mrf.mxu0 }
 0x20f   :  { %3218 = vtanh.f32 %v3699_v62 }
 0x21c   :  { %v3219_v2 = vpop.eup %3218 }
 0x21d   :  { %430 = vrot.lane.b32.xlu0 %v3219_v2, %s3415_s0 }
 0x28f   :  { %v431_v0 = vpop.permute.xlu0 %430 }
 0x290   :  { %v433_v56 = vmul.f32 %v431_v0, %v427_v61  ;;  %v168_v0 = vrot.slane %v159_v3, %v3545_v29  ;;  %v660_v29 = vld [vmem:[#allocation2 + $0x1] ss:$8 sm:$0x3] }
 0x292   :  { %3147 = vmatmul.mubr.msk.f32.vlgmr.msra.gmra.mxu0 %vm171_vm1, %v433_v56  ;;  %v244_v2 = vadd.f32 %v243_v63, %v168_v0 }
 0x293   :  { %694 = vmatpush1.msra.mxu0 %v3488_v8  ;;  %741 = vmatprep.mubr.f32.mxu0 %v4453_v7 }
 0x294   :  { %695 = vmatprep.subr.mxu0 %v3490_v9 }
 0x295   :  { %696 = vmatpush1.msra.mxu0 %v3493_v10 }
 0x296   :  { %697 = vmatprep.subr.mxu0 %v3496_v11 }
 0x297   :  { %698 = vmatpush1.msra.mxu0 %v3499_v12 }
 0x298   :  { %699 = vmatprep.subr.mxu0 %v3504_v14 }
 0x299   :  { %700 = vmatpush1.msra.mxu0 %v3507_v15 }
 0x29a   :  { %701 = vmatprep.subr.mxu0 %v3513_v17 }
 0x29b   :  { %702 = vmatpush1.msra.mxu0 %v3516_v19 }
 0x29c   :  { %703 = vmatprep.subr.mxu0 %v3520_v21 }
 0x29d   :  { %704 = vmatpush1.msra.mxu0 %v3523_v22 }
 0x29e   :  { %705 = vmatprep.subr.mxu0 %v3527_v23 }
 0x29f   :  { %706 = vmatpush1.msra.mxu0 %v3530_v24 }
 0x2a0   :  { %707 = vmatprep.subr.mxu0 %v3533_v25 }
 0x2a1   :  { %708 = vmatpush1.msra.mxu0 %v3536_v26 }
 0x2a2   :  { %3149 = vmatmul.mubr.msk.f32.vlgmr.msra.gmra.mxu0 %vm171_vm1, %v433_v56  ;;  %956 = vmatprep.subr.mxu0 %v3586_v4 }
 0x2a3   :  { %957 = vmatpush1.msra.mxu0 %v3588_v5  ;;  %1004 = vmatprep.mubr.f32.mxu0 %v4453_v7 }
 0x2a4   :  { %958 = vmatprep.subr.mxu0 %v3590_v6 }
 0x2a5   :  { %959 = vmatpush1.msra.mxu0 %v3593_v16 }
 0x2a6   :  { %960 = vmatprep.subr.mxu0 %v3597_v18 }
 0x2a7   :  { %961 = vmatpush1.msra.mxu0 %v3601_v20 }
 0x2a8   :  { %962 = vmatprep.subr.mxu0 %v3605_v27 }
 0x2a9   :  { %963 = vmatpush1.msra.mxu0 %v3609_v30 }
 0x2aa   :  { %964 = vmatprep.subr.mxu0 %v3613_v31 }
 0x2ab   :  { %965 = vmatpush1.msra.mxu0 %v3617_v32 }
 0x2ac   :  { %966 = vmatprep.subr.mxu0 %v3621_v33 }
 0x2ad   :  { %967 = vmatpush1.msra.mxu0 %v3625_v34 }
 0x2ae   :  { %968 = vmatprep.subr.mxu0 %v3629_v35 }
 0x2af   :  { %969 = vmatpush1.msra.mxu0 %v3633_v36 }
 0x2b0   :  { %970 = vmatprep.subr.mxu0 %v3637_v37 }
 0x2b1   :  { %971 = vmatpush1.msra.mxu0 %v3641_v38 }
 0x2b2   :  { %1178 = vmatprep.subr.mxu0 %v3645_v40 }
 0x352   :  { %v519_v56 = vpop.f32.mrf.mxu0 }
 0x353   :  { %v524_v39 = vadd.f32 %v519_v56, %v242_v59  ;;  %v142_v59 = vld [vmem:[#allocation4 + $0x3] sm:$0x1] }
 0x354   :  { %v521_v58 = vpop.f32.mrf.mxu0 }
 0x355   :  { %v525_v61 = vadd.f32 %v521_v58, %v244_v2 }
 0x357   :  { %v527_v28 = vmul.f32 %v525_v61, %v3559_v44 }
 0x359   :  { %3220 = vtanh.f32 %v527_v28 }
 0x362   :  { %v743_v35 = vpop.f32.mrf.mxu0 }
 0x364   :  { %v745_v34 = vpop.f32.mrf.mxu0 }
 0x365   :  { %v750_v36 = vcombine.low %v743_v35, %v745_v34 }
 0x366   :  { %v3221_v33 = vpop.eup %3220 }
 0x367   :  { %v757_v37 = vrot.slane %v750_v36, %v3501_v13  ;;  %v531_v38 = vmul.f32 %v3221_v33, %v3559_v44  ;;  %v526_v33 = vmul.f32 0.5, %v524_v39 }
 0x369   :  { %v764_v40 = vrot.slane %v757_v37, %v3501_v13  ;;  %v533_v3 = vadd.f32 %v531_v38, %v3571_v57 }
 0x36b   :  { %v766_v0 = vadd.f32 %v764_v40, %v660_v29  ;;  %540 = vrot.lane.b32.xlu1 %v533_v3, %s3415_s0 }
 0x36d   :  { %v767_v63 = vmul.f32 %v766_v0, %v3566_v54 }
 0x36f   :  { %3222 = vtanh.f32 %v767_v63  ;;  %535 = vrot.lane.b32.xlu1 %v142_v59, %s3415_s0 }
 0x370   :  { %3224 = vtanh.f32 %v526_v33 }
 0x37c   :  { %v3223_v28 = vpop.eup %3222 }
 0x37d   :  { %v769_v34 = vmul.f32 %v3223_v28, %v3566_v54  ;;  %v3225_v36 = vpop.eup %3224 }
 0x37e   :  { %v530_v37 = vmul.f32 0.5, %v3225_v36 }
 0x37f   :  { %v770_v35 = vadd.f32 %v769_v34, %v3576_v60 }
 0x380   :  { %v532_v29 = vadd.f32 0.5, %v530_v37 }
 0x381   :  { %773 = vrot.lane.b32.xlu0 %v770_v35, %s3415_s0  ;;  %v771_v28 = vmul.f32 %v770_v35, %v3699_v62  ;;  %v4454_v62 = vld [vmem:[#allocation28_spill] sm:$0xff] }
 0x3dd   :  { %v541_v38 = vpop.permute.xlu1 %540 }
 0x3de   :  { %v543_v40 = vmul.f32 %v541_v38, %v532_v29  ;;  %v784_v38 = vrot.slane %v770_v35, 1 }
 0x3e0   :  { %545 = vrot.lane.b32.xlu0 %v543_v40, %s3415_s0 }
 0x3e1   :  { %v536_v61 = vpop.permute.xlu1 %535 }
 0x3e2   :  { %v538_v0 = vmul.f32 %v536_v61, %v532_v29 }
 0x3f3   :  { %v774_v56 = vpop.permute.xlu0 %773 }
 0x3f4   :  { %v775_v2 = vrot.slane %v774_v56, 1 }
 0x3f6   :  { %v777_v58 = vmul.f32 %v775_v2, %v770_v35  ;;  %v4458_v35 = vld [vmem:[#allocation23_spill] sm:$0xff]  ;;  %v4464_v2 = vld [vmem:[#allocation20_spill] sm:$0xff] }
 0x3f8   :  { %779 = vrot.lane.b32.xlu1 %v777_v58, %s3415_s0 }
 0x452   :  { %v546_v59 = vpop.permute.xlu0 %545 }
 0x453   :  { %v3762_v63 = vadd.f32 %v546_v59, %v538_v0 }
 0x455   :  { %3226 = vtanh.f32 %v3762_v63 }
 0x462   :  { %v3227_v39 = vpop.eup %3226 }
 0x463   :  { %551 = vrot.lane.b32.xlu0 %v3227_v39, %s3415_s0 }
 0x46a   :  { %v780_v34 = vpop.permute.xlu1 %779 }
 0x46b   :  { %v3767_v33 = vadd.f32 %v780_v34, %v771_v28 }
 0x46d   :  { %3228 = vtanh.f32 %v3767_v33 }
 0x47a   :  { %v3229_v36 = vpop.eup %3228 }
 0x47b   :  { %787 = vrot.lane.b32.xlu1 %v3229_v36, %s3415_s0 }
 0x4d5   :  { %v552_v37 = vpop.permute.xlu0 %551 }
 0x4d6   :  { %v554_v29 = vmul.f32 %v552_v37, %v533_v3  ;;  %v4455_v3 = vld [vmem:[#allocation18_spill] sm:$0xff] }
 0x4d8   :  { %556 = vst.msk [vmem:[#allocation3] sm:$0x1] %vm555_vm3, %v554_v29  ;;  %3148 = vmatmul.mubr.msk.f32.vlgmr.msra.gmra.mxu1 %vm171_vm1, %v554_v29 }
 0x4d9   :  { %827 = vmatpush1.msra.mxu1 %v3649_v41  ;;  %874 = vmatprep.mubr.f32.mxu1 %v4453_v7 }
 0x4da   :  { %828 = vmatprep.subr.mxu1 %v3653_v42 }
 0x4db   :  { %829 = vmatpush1.msra.mxu1 %v3658_v43 }
 0x4dc   :  { %830 = vmatprep.subr.mxu1 %v3661_v45 }
 0x4dd   :  { %831 = vmatpush1.msra.mxu1 %v3665_v46 }
 0x4de   :  { %832 = vmatprep.subr.mxu1 %v3669_v47 }
 0x4df   :  { %833 = vmatpush1.msra.mxu1 %v3672_v48 }
 0x4e0   :  { %834 = vmatprep.subr.mxu1 %v3675_v49 }
 0x4e1   :  { %835 = vmatpush1.msra.mxu1 %v3678_v50 }
 0x4e2   :  { %836 = vmatprep.subr.mxu1 %v3681_v51 }
 0x4e3   :  { %837 = vmatpush1.msra.mxu1 %v3684_v52 }
 0x4e4   :  { %838 = vmatprep.subr.mxu1 %v3687_v53 }
 0x4e5   :  { %839 = vmatpush1.msra.mxu1 %v3690_v55 }
 0x4e6   :  { %840 = vmatprep.subr.mxu1 %v4454_v62 }
 0x4e7   :  { %841 = vmatpush1.msra.mxu1 %v3702_v1 }
 0x4e8   :  { %1045 = vmatprep.subr.mxu1 %v4455_v3 }
 0x4ed   :  { %v788_v40 = vpop.permute.xlu1 %787 }
 0x4ee   :  { %v790_v56 = vmul.f32 %v788_v40, %v784_v38 }
 0x4f0   :  { %3150 = vmatmul.mubr.msk.f32.vlgmr.msra.gmra.mxu1 %vm171_vm1, %v790_v56 }
 0x4f1   :  { %1046 = vmatpush1.msra.mxu1 %v3488_v8  ;;  %1093 = vmatprep.mubr.f32.mxu1 %v4453_v7 }
 0x4f2   :  { %1047 = vmatprep.subr.mxu1 %v3490_v9 }
 0x4f3   :  { %1048 = vmatpush1.msra.mxu1 %v3493_v10 }
 0x4f4   :  { %1049 = vmatprep.subr.mxu1 %v3496_v11 }
 0x4f5   :  { %1050 = vmatpush1.msra.mxu1 %v3499_v12 }
 0x4f6   :  { %1051 = vmatprep.subr.mxu1 %v3504_v14 }
 0x4f7   :  { %1052 = vmatpush1.msra.mxu1 %v3507_v15 }
 0x4f8   :  { %1053 = vmatprep.subr.mxu1 %v3513_v17 }
 0x4f9   :  { %1054 = vmatpush1.msra.mxu1 %v3516_v19 }
 0x4fa   :  { %1055 = vmatprep.subr.mxu1 %v3520_v21 }
 0x4fb   :  { %1056 = vmatpush1.msra.mxu1 %v3523_v22 }
 0x4fc   :  { %1057 = vmatprep.subr.mxu1 %v3527_v23 }
 0x4fd   :  { %1058 = vmatpush1.msra.mxu1 %v3530_v24 }
 0x4fe   :  { %1059 = vmatprep.subr.mxu1 %v3533_v25 }
 0x4ff   :  { %1060 = vmatpush1.msra.mxu1 %v3536_v26 }
 0x500   :  { %3152 = vmatmul.mubr.msk.f32.vlgmr.msra.gmra.mxu1 %vm171_vm1, %v790_v56  ;;  %1308 = vmatprep.subr.mxu1 %v3586_v4  ;;  %v4456_v4 = vld [vmem:[#allocation21_spill] sm:$0xff] }
 0x501   :  { %1309 = vmatpush1.msra.mxu1 %v3588_v5  ;;  %1356 = vmatprep.mubr.f32.mxu1 %v4453_v7  ;;  %v4457_v5 = vld [vmem:[#allocation22_spill] sm:$0xff] }
 0x502   :  { %1310 = vmatprep.subr.mxu1 %v3590_v6  ;;  %v4459_v6 = vld [vmem:[#allocation24_spill] sm:$0xff] }
 0x503   :  { %1311 = vmatpush1.msra.mxu1 %v3593_v16  ;;  %v4460_v16 = vld [vmem:[#allocation25_spill] sm:$0xff] }
 0x504   :  { %1312 = vmatprep.subr.mxu1 %v3597_v18  ;;  %v4461_v18 = vld [vmem:[#allocation26_spill] sm:$0xff] }
 0x505   :  { %1313 = vmatpush1.msra.mxu1 %v3601_v20  ;;  %v4462_v20 = vld [vmem:[#allocation27_spill] sm:$0xff] }
 0x506   :  { %1314 = vmatprep.subr.mxu1 %v3605_v27  ;;  %v573_v27 = vld [vmem:[%s4409_s6] sm:$0x3] }
 0x507   :  { %1315 = vmatpush1.msra.mxu1 %v3609_v30  ;;  %v582_v58 = vrot.slane %v573_v27, %v4464_v2 }
 0x508   :  { %1316 = vmatprep.subr.mxu1 %v3613_v31  ;;  %v4463_v31 = vld [vmem:[#allocation19_spill] sm:$0xff] }
 0x509   :  { %1317 = vmatpush1.msra.mxu1 %v3617_v32  ;;  %v578_v32 = vrot.slane %v573_v27, %v4463_v31 }
 0x50a   :  { %1318 = vmatprep.subr.mxu1 %v4456_v4 }
 0x50b   :  { %1319 = vmatpush1.msra.mxu1 %v4457_v5 }
 0x50c   :  { %1320 = vmatprep.subr.mxu1 %v4458_v35 }
 0x50d   :  { %1321 = vmatpush1.msra.mxu1 %v4459_v6 }
 0x50e   :  { %1322 = vmatprep.subr.mxu1 %v4460_v16  ;;  %v1012_v16 = vld [vmem:[#allocation2 + $0x2] ss:$8 sm:$0x3] }
 0x50f   :  { %1323 = vmatpush1.msra.mxu1 %v4461_v18 }
 0x510   :  { %1530 = vmatprep.subr.mxu1 %v4462_v20 }
 0x598   :  { %v654_v30 = vpop.f32.mrf.mxu1 }
 0x599   :  { %v655_v0 = vadd.f32 %v654_v30, %v578_v32 }
 0x59a   :  { %v656_v61 = vpop.f32.mrf.mxu1 }
 0x59b   :  { %v657_v39 = vadd.f32 %v656_v61, %v582_v58 }
 0x5b0   :  { %v876_v59 = vpop.f32.mrf.mxu1 }
 0x5b1   :  { %v881_v28 = vadd.f32 %v876_v59, %v655_v0 }
 0x5b2   :  { %v878_v34 = vpop.f32.mrf.mxu1 }
 0x5b3   :  { %v882_v36 = vadd.f32 %v878_v34, %v657_v39  ;;  %v883_v58 = vmul.f32 0.5, %v881_v28 }
 0x5b5   :  { %v884_v37 = vmul.f32 %v882_v36, %v3559_v44 }
 0x5b7   :  { %3230 = vtanh.f32 %v884_v37 }
 0x5c0   :  { %v1095_v29 = vpop.f32.mrf.mxu1 }
 0x5c2   :  { %v1097_v38 = vpop.f32.mrf.mxu1 }
 0x5c3   :  { %v1102_v40 = vcombine.low %v1095_v29, %v1097_v38 }
 0x5c4   :  { %v3231_v56 = vpop.eup %3230 }
 0x5c5   :  { %v1109_v4 = vrot.slane %v1102_v40, %v3501_v13  ;;  %v888_v5 = vmul.f32 %v3231_v56, %v3559_v44 }
 0x5c7   :  { %v1116_v35 = vrot.slane %v1109_v4, %v3501_v13  ;;  %v890_v6 = vadd.f32 %v888_v5, %v3571_v57 }
 0x5c9   :  { %v1118_v18 = vadd.f32 %v1116_v35, %v1012_v16  ;;  %893 = vrot.lane.b32.xlu0 %v890_v6, %s3415_s0 }
 0x5cb   :  { %v1119_v20 = vmul.f32 %v1118_v18, %v3566_v54 }
 0x5cd   :  { %3232 = vtanh.f32 %v1119_v20 }
 0x5ce   :  { %3234 = vtanh.f32 %v883_v58 }
 0x5da   :  { %v3233_v27 = vpop.eup %3232 }
 0x5db   :  { %v1121_v30 = vmul.f32 %v3233_v27, %v3566_v54  ;;  %v3235_v61 = vpop.eup %3234 }
 0x5dc   :  { %v887_v0 = vmul.f32 0.5, %v3235_v61  ;;  %v1364_v61 = vld [vmem:[#allocation2 + $0x3] ss:$8 sm:$0x3] }
 0x5dd   :  { %v1122_v32 = vadd.f32 %v1121_v30, %v3576_v60 }
 0x5de   :  { %v889_v59 = vadd.f32 0.5, %v887_v0 }
 0x5df   :  { %1125 = vrot.lane.b32.xlu1 %v1122_v32, %s3415_s0  ;;  %v1123_v4 = vmul.f32 %v1122_v32, %v3767_v33  ;;  %v1136_v33 = vrot.slane %v1122_v32, 1 }
 0x5e0   :  { %v891_v38 = vmul.f32 %v889_v59, %v3762_v63 }
 0x63b   :  { %v894_v39 = vpop.permute.xlu0 %893 }
 0x63c   :  { %v896_v34 = vmul.f32 %v894_v39, %v889_v59 }
 0x63e   :  { %898 = vrot.lane.b32.xlu0 %v896_v34, %s3415_s0 }
 0x651   :  { %v1126_v36 = vpop.permute.xlu1 %1125 }
 0x652   :  { %v1127_v37 = vrot.slane %v1126_v36, 1 }
 0x654   :  { %v1129_v29 = vmul.f32 %v1127_v37, %v1122_v32 }
 0x656   :  { %1131 = vrot.lane.b32.xlu1 %v1129_v29, %s3415_s0 }
 0x6b0   :  { %v899_v40 = vpop.permute.xlu0 %898 }
 0x6b1   :  { %v3844_v56 = vadd.f32 %v899_v40, %v891_v38 }
 0x6b3   :  { %3236 = vtanh.f32 %v3844_v56 }
 0x6c0   :  { %v3237_v28 = vpop.eup %3236 }
 0x6c1   :  { %904 = vrot.lane.b32.xlu0 %v3237_v28, %s3415_s0 }
 0x6c8   :  { %v1132_v5 = vpop.permute.xlu1 %1131 }
 0x6c9   :  { %v3849_v35 = vadd.f32 %v1132_v5, %v1123_v4 }
 0x6cb   :  { %3238 = vtanh.f32 %v3849_v35 }
 0x6d8   :  { %v3239_v16 = vpop.eup %3238 }
 0x6d9   :  { %1139 = vrot.lane.b32.xlu1 %v3239_v16, %s3415_s0 }
 0x733   :  { %v905_v18 = vpop.permute.xlu0 %904 }
 0x734   :  { %v907_v63 = vmul.f32 %v905_v18, %v890_v6 }
 0x736   :  { %908 = vst.msk [vmem:[#allocation3 + $0x1] sm:$0x1] %vm555_vm3, %v907_v63  ;;  %3151 = vmatmul.mubr.msk.f32.vlgmr.msra.gmra.mxu0 %vm171_vm1, %v907_v63 }
 0x737   :  { %1179 = vmatpush1.msra.mxu0 %v3649_v41  ;;  %1226 = vmatprep.mubr.f32.mxu0 %v4453_v7 }
 0x738   :  { %1180 = vmatprep.subr.mxu0 %v3653_v42 }
 0x739   :  { %1181 = vmatpush1.msra.mxu0 %v3658_v43 }
 0x73a   :  { %1182 = vmatprep.subr.mxu0 %v3661_v45 }
 0x73b   :  { %1183 = vmatpush1.msra.mxu0 %v3665_v46 }
 0x73c   :  { %1184 = vmatprep.subr.mxu0 %v3669_v47 }
 0x73d   :  { %1185 = vmatpush1.msra.mxu0 %v3672_v48 }
 0x73e   :  { %1186 = vmatprep.subr.mxu0 %v3675_v49 }
 0x73f   :  { %1187 = vmatpush1.msra.mxu0 %v3678_v50 }
 0x740   :  { %1188 = vmatprep.subr.mxu0 %v3681_v51 }
 0x741   :  { %1189 = vmatpush1.msra.mxu0 %v3684_v52 }
 0x742   :  { %1190 = vmatprep.subr.mxu0 %v3687_v53 }
 0x743   :  { %1191 = vmatpush1.msra.mxu0 %v3690_v55 }
 0x744   :  { %1192 = vmatprep.subr.mxu0 %v4454_v62 }
 0x745   :  { %1193 = vmatpush1.msra.mxu0 %v3702_v1 }
 0x746   :  { %1397 = vmatprep.subr.mxu0 %v4455_v3 }
 0x74b   :  { %v1140_v6 = vpop.permute.xlu1 %1139 }
 0x74c   :  { %v1142_v20 = vmul.f32 %v1140_v6, %v1136_v33 }
 0x74e   :  { %3153 = vmatmul.mubr.msk.f32.vlgmr.msra.gmra.mxu0 %vm171_vm1, %v1142_v20 }
 0x74f   :  { %1398 = vmatpush1.msra.mxu0 %v3488_v8  ;;  %1445 = vmatprep.mubr.f32.mxu0 %v4453_v7  ;;  %v925_v8 = vld [vmem:[%s4409_s6] sm:$0x3] }
 0x750   :  { %1399 = vmatprep.subr.mxu0 %v3490_v9 }
 0x751   :  { %1400 = vmatpush1.msra.mxu0 %v3493_v10  ;;  %v930_v10 = vrot.slane %v925_v8, %v4463_v31 }
 0x752   :  { %1401 = vmatprep.subr.mxu0 %v3496_v11  ;;  %v934_v11 = vrot.slane %v925_v8, %v4464_v2 }
 0x753   :  { %1402 = vmatpush1.msra.mxu0 %v3499_v12 }
 0x754   :  { %1403 = vmatprep.subr.mxu0 %v3504_v14 }
 0x755   :  { %1404 = vmatpush1.msra.mxu0 %v3507_v15 }
 0x756   :  { %1405 = vmatprep.subr.mxu0 %v3513_v17 }
 0x757   :  { %1406 = vmatpush1.msra.mxu0 %v3516_v19 }
 0x758   :  { %1407 = vmatprep.subr.mxu0 %v3520_v21 }
 0x759   :  { %1408 = vmatpush1.msra.mxu0 %v3523_v22 }
 0x75a   :  { %1409 = vmatprep.subr.mxu0 %v3527_v23 }
 0x75b   :  { %1410 = vmatpush1.msra.mxu0 %v3530_v24 }
 0x75c   :  { %1411 = vmatprep.subr.mxu0 %v3533_v25 }
 0x75d   :  { %1412 = vmatpush1.msra.mxu0 %v3536_v26 }
 0x75e   :  { %3155 = vmatmul.mubr.msk.f32.vlgmr.msra.gmra.mxu0 %vm171_vm1, %v1142_v20 }
 0x75f   :  { %1708 = vmatprep.mubr.f32.mxu0 %v4453_v7 }
 0x7f6   :  { %v1006_v9 = vpop.f32.mrf.mxu0 }
 0x7f7   :  { %v1007_v14 = vadd.f32 %v1006_v9, %v930_v10 }
 0x7f8   :  { %v1008_v12 = vpop.f32.mrf.mxu0 }
 0x7f9   :  { %v1009_v17 = vadd.f32 %v1008_v12, %v934_v11 }
 0x80e   :  { %v1228_v15 = vpop.f32.mrf.mxu0 }
 0x80f   :  { %v1233_v19 = vadd.f32 %v1228_v15, %v1007_v14  ;;  %v3975_v14 = vld [vmem:[#allocation5 + $0x10] sm:$0xff]  ;;  %v3978_v15 = vld [vmem:[#allocation5 + $0x8] sm:$0xff] }
 0x810   :  { %v1230_v21 = vpop.f32.mrf.mxu0 }
 0x811   :  { %v1234_v22 = vadd.f32 %v1230_v21, %v1009_v17  ;;  %v1235_v37 = vmul.f32 0.5, %v1233_v19  ;;  %v3981_v17 = vld [vmem:[#allocation5] sm:$0xff] }
 0x812   :  { %v1277_v19 = vld [vmem:[%s4409_s6] sm:$0x3] }
 0x813   :  { %v1236_v23 = vmul.f32 %v1234_v22, %v3559_v44  ;;  %v1282_v22 = vrot.slane %v1277_v19, %v4463_v31 }
 0x815   :  { %3240 = vtanh.f32 %v1236_v23  ;;  %v1286_v23 = vrot.slane %v1277_v19, %v4464_v2  ;;  %v4019_v19 = vld [vmem:[#allocation10 + $0x60] sm:$0xff] }
 0x81e   :  { %v1447_v24 = vpop.f32.mrf.mxu0 }
 0x820   :  { %v1449_v25 = vpop.f32.mrf.mxu0 }
 0x821   :  { %v1454_v26 = vcombine.low %v1447_v24, %v1449_v25 }
 0x822   :  { %v3241_v3 = vpop.eup %3240 }
 0x823   :  { %v1461_v27 = vrot.slane %v1454_v26, %v3501_v13  ;;  %v1240_v30 = vmul.f32 %v3241_v3, %v3559_v44 }
 0x825   :  { %v1468_v32 = vrot.slane %v1461_v27, %v3501_v13  ;;  %v1242_v58 = vadd.f32 %v1240_v30, %v3571_v57 }
 0x827   :  { %v1470_v0 = vadd.f32 %v1468_v32, %v1364_v61  ;;  %1245 = vrot.lane.b32.xlu0 %v1242_v58, %s3415_s0 }
 0x829   :  { %v1471_v59 = vmul.f32 %v1470_v0, %v3566_v54 }
 0x82b   :  { %3242 = vtanh.f32 %v1471_v59 }
 0x82c   :  { %3244 = vtanh.f32 %v1235_v37 }
 0x838   :  { %v3243_v39 = vpop.eup %3242 }
 0x839   :  { %v1473_v34 = vmul.f32 %v3243_v39, %v3566_v54  ;;  %v3245_v29 = vpop.eup %3244 }
 0x83a   :  { %v1239_v38 = vmul.f32 0.5, %v3245_v29 }
 0x83b   :  { %v1474_v36 = vadd.f32 %v1473_v34, %v3576_v60 }
 0x83c   :  { %v1241_v40 = vadd.f32 0.5, %v1239_v38  ;;  %v1716_v38 = vld [vmem:[#allocation2 + $0x4] ss:$8 sm:$0x3] }
 0x83d   :  { %1477 = vrot.lane.b32.xlu1 %v1474_v36, %s3415_s0  ;;  %v1475_v8 = vmul.f32 %v1474_v36, %v3849_v35  ;;  %v3972_v35 = vld [vmem:[#allocation5 + $0x18] sm:$0xff] }
 0x83e   :  { %v1243_v63 = vmul.f32 %v1241_v40, %v3844_v56 }
 0x899   :  { %v1246_v28 = vpop.permute.xlu0 %1245 }
 0x89a   :  { %v1248_v4 = vmul.f32 %v1246_v28, %v1241_v40 }
 0x89c   :  { %1250 = vrot.lane.b32.xlu0 %v1248_v4, %s3415_s0 }
 0x8af   :  { %v1478_v5 = vpop.permute.xlu1 %1477 }
 0x8b0   :  { %v1479_v16 = vrot.slane %v1478_v5, 1 }
 0x8b2   :  { %v1481_v18 = vmul.f32 %v1479_v16, %v1474_v36 }
 0x8b4   :  { %1483 = vrot.lane.b32.xlu1 %v1481_v18, %s3415_s0 }
 0x90e   :  { %v1251_v33 = vpop.permute.xlu0 %1250 }
 0x90f   :  { %v3909_v6 = vadd.f32 %v1251_v33, %v1243_v63 }
 0x911   :  { %3246 = vtanh.f32 %v3909_v6 }
 0x91e   :  { %v3247_v20 = vpop.eup %3246 }
 0x91f   :  { %1256 = vrot.lane.b32.xlu0 %v3247_v20, %s3415_s0 }
 0x926   :  { %v1484_v9 = vpop.permute.xlu1 %1483 }
 0x927   :  { %v3914_v10 = vadd.f32 %v1484_v9, %v1475_v8 }
 0x929   :  { %3248 = vtanh.f32 %v3914_v10 }
 0x936   :  { %v3249_v11 = vpop.eup %3248 }
 0x937   :  { %1491 = vrot.lane.b32.xlu1 %v3249_v11, %s3415_s0 }
 0x991   :  { %v1257_v12 = vpop.permute.xlu0 %1256 }
 0x992   :  { %v1259_v56 = vmul.f32 %v1257_v12, %v1242_v58 }
 0x994   :  { %1260 = vst.msk [vmem:[#allocation3 + $0x2] sm:$0x1] %vm555_vm3, %v1259_v56  ;;  %3154 = vmatmul.mubr.msk.f32.vlgmr.msra.gmra.mxu1 %vm171_vm1, %v1259_v56 }
 0x995   :  { %1531 = vmatpush1.msra.mxu1 %v3649_v41  ;;  %1578 = vmatprep.mubr.f32.mxu1 %v4453_v7  ;;  %v3934_v41 = vld [vmem:[#allocation5 + $0x78] sm:$0xff] }
 0x996   :  { %1532 = vmatprep.subr.mxu1 %v3653_v42  ;;  %v1488_v42 = vrot.slane %v1474_v36, 1 }
 0x997   :  { %1533 = vmatpush1.msra.mxu1 %v3658_v43 }
 0x998   :  { %1534 = vmatprep.subr.mxu1 %v3661_v45 }
 0x999   :  { %1535 = vmatpush1.msra.mxu1 %v3665_v46  ;;  %v3939_v46 = vld [vmem:[#allocation5 + $0x70] sm:$0xff] }
 0x99a   :  { %1536 = vmatprep.subr.mxu1 %v3669_v47  ;;  %v3941_v47 = vld [vmem:[#allocation5 + $0x68] sm:$0xff] }
 0x99b   :  { %1537 = vmatpush1.msra.mxu1 %v3672_v48  ;;  %v3944_v48 = vld [vmem:[#allocation5 + $0x60] sm:$0xff] }
 0x99c   :  { %1538 = vmatprep.subr.mxu1 %v3675_v49  ;;  %v3947_v49 = vld [vmem:[#allocation5 + $0x58] sm:$0xff] }
 0x99d   :  { %1539 = vmatpush1.msra.mxu1 %v3678_v50  ;;  %v3951_v50 = vld [vmem:[#allocation5 + $0x50] sm:$0xff] }
 0x99e   :  { %1540 = vmatprep.subr.mxu1 %v3681_v51  ;;  %v3954_v51 = vld [vmem:[#allocation5 + $0x48] sm:$0xff] }
 0x99f   :  { %1541 = vmatpush1.msra.mxu1 %v3684_v52  ;;  %v3957_v52 = vld [vmem:[#allocation5 + $0x40] sm:$0xff] }
 0x9a0   :  { %1542 = vmatprep.subr.mxu1 %v3687_v53  ;;  %v3960_v53 = vld [vmem:[#allocation5 + $0x38] sm:$0xff] }
 0x9a1   :  { %1543 = vmatpush1.msra.mxu1 %v3690_v55  ;;  %v3963_v55 = vld [vmem:[#allocation5 + $0x30] sm:$0xff] }
 0x9a2   :  { %1544 = vmatprep.subr.mxu1 %v4454_v62  ;;  %v3969_v62 = vld [vmem:[#allocation5 + $0x20] sm:$0xff] }
 0x9a3   :  { %1545 = vmatpush1.msra.mxu1 %v3702_v1  ;;  %v3966_v1 = vld [vmem:[#allocation5 + $0x28] sm:$0xff] }
 0x9a4   :  { %1749 = vmatprep.subr.mxu1 %v3934_v41 }
 0x9a9   :  { %v1492_v43 = vpop.permute.xlu1 %1491 }
 0x9aa   :  { %v1494_v45 = vmul.f32 %v1492_v43, %v1488_v42  ;;  %v4012_v42 = vld [vmem:[#allocation10 + $0x78] sm:$0xff]  ;;  %v4014_v43 = vld [vmem:[#allocation10 + $0x70] sm:$0xff] }
 0x9ab   :  { %1660 = vmatprep.subr.mxu0 %v4012_v42 }
 0x9ac   :  { %3156 = vmatmul.mubr.msk.f32.vlgmr.msra.gmra.mxu1 %vm171_vm1, %v1494_v45  ;;  %1661 = vmatpush1.msra.mxu0 %v4014_v43 }
 0x9ad   :  { %1750 = vmatpush1.msra.mxu1 %v3939_v46  ;;  %1797 = vmatprep.mubr.f32.mxu1 %v4453_v7 }
 0x9ae   :  { %1751 = vmatprep.subr.mxu1 %v3941_v47 }
 0x9af   :  { %1752 = vmatpush1.msra.mxu1 %v3944_v48 }
 0x9b0   :  { %1753 = vmatprep.subr.mxu1 %v3947_v49 }
 0x9b1   :  { %1754 = vmatpush1.msra.mxu1 %v3951_v50 }
 0x9b2   :  { %1755 = vmatprep.subr.mxu1 %v3954_v51 }
 0x9b3   :  { %1756 = vmatpush1.msra.mxu1 %v3957_v52 }
 0x9b4   :  { %1757 = vmatprep.subr.mxu1 %v3960_v53 }
 0x9b5   :  { %1758 = vmatpush1.msra.mxu1 %v3963_v55 }
 0x9b6   :  { %1759 = vmatprep.subr.mxu1 %v3966_v1 }
 0x9b7   :  { %1760 = vmatpush1.msra.mxu1 %v3969_v62 }
 0x9b8   :  { %1761 = vmatprep.subr.mxu1 %v3972_v35 }
 0x9b9   :  { %1762 = vmatpush1.msra.mxu1 %v3975_v14 }
 0x9ba   :  { %1763 = vmatprep.subr.mxu1 %v3978_v15 }
 0x9bb   :  { %1764 = vmatpush1.msra.mxu1 %v3981_v17 }
 0x9bc   :  { %3158 = vmatmul.mubr.msk.f32.vlgmr.msra.gmra.mxu1 %vm171_vm1, %v1494_v45  ;;  %v4016_v45 = vld [vmem:[#allocation10 + $0x68] sm:$0xff]  ;;  %2012 = vmatprep.subr.mxu1 %v4012_v42 }
 0x9bd   :  { %2060 = vmatprep.mubr.f32.mxu1 %v4453_v7  ;;  %2013 = vmatpush1.msra.mxu1 %v4014_v43 }
 0x9be   :  { %1662 = vmatprep.subr.mxu0 %v4016_v45  ;;  %2014 = vmatprep.subr.mxu1 %v4016_v45 }
 0x9bf   :  { %1663 = vmatpush1.msra.mxu0 %v4019_v19  ;;  %2015 = vmatpush1.msra.mxu1 %v4019_v19 }
 0xa54   :  { %v1358_v21 = vpop.f32.mrf.mxu1 }
 0xa55   :  { %v1359_v25 = vadd.f32 %v1358_v21, %v1282_v22  ;;  %v4023_v21 = vld [vmem:[#allocation10 + $0x58] sm:$0xff]  ;;  %v4027_v22 = vld [vmem:[#allocation10 + $0x50] sm:$0xff] }
 0xa56   :  { %v1360_v24 = vpop.f32.mrf.mxu1  ;;  %1664 = vmatprep.subr.mxu0 %v4023_v21  ;;  %2016 = vmatprep.subr.mxu1 %v4023_v21 }
 0xa57   :  { %v1361_v3 = vadd.f32 %v1360_v24, %v1286_v23  ;;  %v4031_v23 = vld [vmem:[#allocation10 + $0x48] sm:$0xff]  ;;  %v4035_v24 = vld [vmem:[#allocation10 + $0x40] sm:$0xff]  ;;  %1665 = vmatpush1.msra.mxu0 %v4027_v22  ;;  %2017 = vmatpush1.msra.mxu1 %v4027_v22 }
 0xa58   :  { %4465 = vst [vmem:[#allocation28_spill] sm:$0xff] %v4031_v23  ;;  %4466 = vst [vmem:[#allocation18_spill] sm:$0xff] %v4035_v24  ;;  %1666 = vmatprep.subr.mxu0 %v4031_v23  ;;  %2018 = vmatprep.subr.mxu1 %v4031_v23 }
 0xa59   :  { %1667 = vmatpush1.msra.mxu0 %v4035_v24  ;;  %2019 = vmatpush1.msra.mxu1 %v4035_v24 }
 0xa6c   :  { %v1580_v26 = vpop.f32.mrf.mxu1 }
 0xa6d   :  { %v1585_v27 = vadd.f32 %v1580_v26, %v1359_v25  ;;  %v4039_v25 = vld [vmem:[#allocation10 + $0x38] sm:$0xff]  ;;  %v4043_v26 = vld [vmem:[#allocation10 + $0x30] sm:$0xff] }
 0xa6e   :  { %v1582_v30 = vpop.f32.mrf.mxu1  ;;  %4467 = vst [vmem:[#allocation21_spill] sm:$0xff] %v4039_v25  ;;  %4468 = vst [vmem:[#allocation22_spill] sm:$0xff] %v4043_v26  ;;  %1668 = vmatprep.subr.mxu0 %v4039_v25  ;;  %2020 = vmatprep.subr.mxu1 %v4039_v25 }
 0xa6f   :  { %v1586_v32 = vadd.f32 %v1582_v30, %v1361_v3  ;;  %v1587_v18 = vmul.f32 0.5, %v1585_v27  ;;  %v4047_v3 = vld [vmem:[#allocation10 + $0x28] sm:$0xff]  ;;  %v4051_v27 = vld [vmem:[#allocation10 + $0x20] sm:$0xff]  ;;  %1669 = vmatpush1.msra.mxu0 %v4043_v26  ;;  %v4055_v30 = vld [vmem:[#allocation10 + $0x18] sm:$0xff]  ;;  %2021 = vmatpush1.msra.mxu1 %v4043_v26 }
 0xa70   :  { %4469 = vst [vmem:[#allocation23_spill] sm:$0xff] %v4047_v3  ;;  %4470 = vst [vmem:[#allocation24_spill] sm:$0xff] %v4051_v27  ;;  %1670 = vmatprep.subr.mxu0 %v4047_v3  ;;  %2022 = vmatprep.subr.mxu1 %v4047_v3 }
 0xa71   :  { %v1588_v58 = vmul.f32 %v1586_v32, %v3559_v44  ;;  %4471 = vst [vmem:[#allocation25_spill] sm:$0xff] %v4055_v30  ;;  %v4059_v32 = vld [vmem:[#allocation10 + $0x10] sm:$0xff]  ;;  %1671 = vmatpush1.msra.mxu0 %v4051_v27  ;;  %2023 = vmatpush1.msra.mxu1 %v4051_v27 }
 0xa72   :  { %4472 = vst [vmem:[#allocation26_spill] sm:$0xff] %v4059_v32  ;;  %1672 = vmatprep.subr.mxu0 %v4055_v30  ;;  %2024 = vmatprep.subr.mxu1 %v4055_v30 }
 0xa73   :  { %3250 = vtanh.f32 %v1588_v58  ;;  %1673 = vmatpush1.msra.mxu0 %v4059_v32  ;;  %2025 = vmatpush1.msra.mxu1 %v4059_v32 }
 0xa7c   :  { %v1799_v61 = vpop.f32.mrf.mxu1 }
 0xa7e   :  { %v1801_v0 = vpop.f32.mrf.mxu1 }
 0xa7f   :  { %v1806_v59 = vcombine.low %v1799_v61, %v1801_v0 }
 0xa80   :  { %v3251_v39 = vpop.eup %3250 }
 0xa81   :  { %v1813_v34 = vrot.slane %v1806_v59, %v3501_v13  ;;  %v1592_v36 = vmul.f32 %v3251_v39, %v3559_v44  ;;  %v4072_v59 = vld [vmem:[#allocation10 + $0x8] sm:$0xff]  ;;  %v4075_v39 = vld [vmem:[#allocation10] sm:$0xff] }
 0xa82   :  { %4473 = vst [vmem:[#allocation27_spill] sm:$0xff] %v4072_v59  ;;  %1674 = vmatprep.subr.mxu0 %v4072_v59  ;;  %4474 = vst [vmem:[#allocation20_spill] sm:$0xff] %v4075_v39  ;;  %2026 = vmatprep.subr.mxu1 %v4072_v59 }
 0xa83   :  { %v1820_v37 = vrot.slane %v1813_v34, %v3501_v13  ;;  %v3998_v29 = vadd.f32 %v1592_v36, %v3571_v57  ;;  %1675 = vmatpush1.msra.mxu0 %v4075_v39  ;;  %v4079_v34 = vld [vmem:[#allocation8 + $0x78] sm:$0xff]  ;;  %2027 = vmatpush1.msra.mxu1 %v4075_v39 }
 0xa84   :  { %4475 = vst [vmem:[#allocation29_spill] sm:$0xff] %v4079_v34  ;;  %1882 = vmatprep.subr.mxu0 %v4079_v34  ;;  %2234 = vmatprep.subr.mxu1 %v4079_v34 }
 0xa85   :  { %v1822_v40 = vadd.f32 %v1820_v37, %v1716_v38  ;;  %1597 = vrot.lane.b32.xlu0 %v3998_v29, %s3415_s0 }
 0xa87   :  { %v1823_v28 = vmul.f32 %v1822_v40, %v3566_v54 }
 0xa89   :  { %3252 = vtanh.f32 %v1823_v28 }
 0xa8a   :  { %3254 = vtanh.f32 %v1587_v18  ;;  %v4094_v18 = vld [vmem:[#allocation8 + $0x68] sm:$0xff] }
 0xa96   :  { %v3253_v4 = vpop.eup %3252 }
 0xa97   :  { %v1825_v5 = vmul.f32 %v3253_v4, %v3566_v54  ;;  %v3255_v63 = vpop.eup %3254 }
 0xa98   :  { %v1591_v33 = vmul.f32 0.5, %v3255_v63  ;;  %v4101_v63 = vld [vmem:[#allocation8 + $0x58] sm:$0xff] }
 0xa99   :  { %v4005_v16 = vadd.f32 %v1825_v5, %v3576_v60  ;;  %v4092_v5 = vld [vmem:[#allocation8 + $0x70] sm:$0xff] }
 0xa9a   :  { %v1593_v20 = vadd.f32 0.5, %v1591_v33  ;;  %v4105_v33 = vld [vmem:[#allocation8 + $0x50] sm:$0xff] }
 0xa9b   :  { %1829 = vrot.lane.b32.xlu1 %v4005_v16, %s3415_s0  ;;  %v1827_v36 = vmul.f32 %v4005_v16, %v3914_v10  ;;  %v4098_v10 = vld [vmem:[#allocation8 + $0x60] sm:$0xff] }
 0xa9c   :  { %v1595_v58 = vmul.f32 %v1593_v20, %v3909_v6 }
 0xaf7   :  { %v1598_v8 = vpop.permute.xlu0 %1597 }
 0xaf8   :  { %v1600_v9 = vmul.f32 %v1598_v8, %v1593_v20  ;;  %v4111_v20 = vld [vmem:[#allocation8 + $0x40] sm:$0xff]  ;;  %v4114_v8 = vld [vmem:[#allocation8 + $0x38] sm:$0xff] }
 0xafa   :  { %1602 = vrot.lane.b32.xlu0 %v1600_v9, %s3415_s0  ;;  %v4117_v9 = vld [vmem:[#allocation8 + $0x30] sm:$0xff] }
 0xb0d   :  { %v1830_v11 = vpop.permute.xlu1 %1829 }
 0xb0e   :  { %v1831_v12 = vrot.slane %v1830_v11, 1  ;;  %v4120_v11 = vld [vmem:[#allocation8 + $0x28] sm:$0xff] }
 0xb10   :  { %v1833_v56 = vmul.f32 %v1831_v12, %v4005_v16  ;;  %v4123_v12 = vld [vmem:[#allocation8 + $0x20] sm:$0xff] }
 0xb12   :  { %1835 = vrot.lane.b32.xlu1 %v1833_v56, %s3415_s0  ;;  %v4126_v56 = vld [vmem:[#allocation8 + $0x18] sm:$0xff] }
 0xb6c   :  { %v1603_v61 = vpop.permute.xlu0 %1602 }
 0xb6d   :  { %v4069_v0 = vadd.f32 %v1603_v61, %v1595_v58  ;;  %v4129_v58 = vld [vmem:[#allocation8 + $0x10] sm:$0xff]  ;;  %v4132_v61 = vld [vmem:[#allocation8 + $0x8] sm:$0xff] }
 0xb6f   :  { %3256 = vtanh.f32 %v4069_v0 }
 0xb7c   :  { %v3257_v6 = vpop.eup %3256 }
 0xb7d   :  { %1608 = vrot.lane.b32.xlu0 %v3257_v6, %s3415_s0  ;;  %v4135_v6 = vld [vmem:[#allocation8] sm:$0xff] }
 0xb84   :  { %v1836_v37 = vpop.permute.xlu1 %1835 }
 0xb85   :  { %v4087_v38 = vadd.f32 %v1836_v37, %v1827_v36  ;;  %v1840_v36 = vrot.slane %v4005_v16, 1  ;;  %v1629_v16 = vld [vmem:[%s4409_s6] sm:$0x3] }
 0xb87   :  { %3258 = vtanh.f32 %v4087_v38 }
 0xb94   :  { %v3259_v40 = vpop.eup %3258 }
 0xb95   :  { %1843 = vrot.lane.b32.xlu1 %v3259_v40, %s3415_s0 }
 0xbef   :  { %v1609_v28 = vpop.permute.xlu0 %1608 }
 0xbf0   :  { %v1611_v4 = vmul.f32 %v1609_v28, %v3998_v29  ;;  %v4108_v29 = vld [vmem:[#allocation8 + $0x48] sm:$0xff] }
 0xbf2   :  { %1612 = vst.msk [vmem:[#allocation3 + $0x3] sm:$0x1] %vm555_vm3, %v1611_v4  ;;  %3157 = vmatmul.mubr.msk.f32.vlgmr.msra.gmra.mxu0 %vm171_vm1, %v1611_v4  ;;  %v1634_v4 = vrot.slane %v1629_v16, %v4463_v31 }
 0xbf3   :  { %1883 = vmatpush1.msra.mxu0 %v4092_v5  ;;  %1930 = vmatprep.mubr.f32.mxu0 %v4453_v7 }
 0xbf4   :  { %1884 = vmatprep.subr.mxu0 %v4094_v18 }
 0xbf5   :  { %1885 = vmatpush1.msra.mxu0 %v4098_v10 }
 0xbf6   :  { %1886 = vmatprep.subr.mxu0 %v4101_v63 }
 0xbf7   :  { %1887 = vmatpush1.msra.mxu0 %v4105_v33 }
 0xbf8   :  { %1888 = vmatprep.subr.mxu0 %v4108_v29 }
 0xbf9   :  { %1889 = vmatpush1.msra.mxu0 %v4111_v20 }
 0xbfa   :  { %1890 = vmatprep.subr.mxu0 %v4114_v8 }
 0xbfb   :  { %1891 = vmatpush1.msra.mxu0 %v4117_v9 }
 0xbfc   :  { %1892 = vmatprep.subr.mxu0 %v4120_v11 }
 0xbfd   :  { %1893 = vmatpush1.msra.mxu0 %v4123_v12 }
 0xbfe   :  { %1894 = vmatprep.subr.mxu0 %v4126_v56 }
 0xbff   :  { %1895 = vmatpush1.msra.mxu0 %v4129_v58 }
 0xc00   :  { %1896 = vmatprep.subr.mxu0 %v4132_v61 }
 0xc01   :  { %1897 = vmatpush1.msra.mxu0 %v4135_v6 }
 0xc02   :  { %2101 = vmatprep.subr.mxu0 %v3934_v41 }
 0xc07   :  { %v1844_v37 = vpop.permute.xlu1 %1843 }
 0xc08   :  { %v1846_v40 = vmul.f32 %v1844_v37, %v1840_v36  ;;  %v1638_v36 = vrot.slane %v1629_v16, %v4464_v2 }
 0xc0a   :  { %3159 = vmatmul.mubr.msk.f32.vlgmr.msra.gmra.mxu0 %vm171_vm1, %v1846_v40 }
 0xc0b   :  { %2102 = vmatpush1.msra.mxu0 %v3939_v46  ;;  %2149 = vmatprep.mubr.f32.mxu0 %v4453_v7 }
 0xc0c   :  { %2103 = vmatprep.subr.mxu0 %v3941_v47 }
 0xc0d   :  { %2104 = vmatpush1.msra.mxu0 %v3944_v48 }
 0xc0e   :  { %2105 = vmatprep.subr.mxu0 %v3947_v49 }
 0xc0f   :  { %2106 = vmatpush1.msra.mxu0 %v3951_v50 }
 0xc10   :  { %2107 = vmatprep.subr.mxu0 %v3954_v51 }
 0xc11   :  { %2108 = vmatpush1.msra.mxu0 %v3957_v52 }
 0xc12   :  { %2109 = vmatprep.subr.mxu0 %v3960_v53 }
 0xc13   :  { %2110 = vmatpush1.msra.mxu0 %v3963_v55 }
 0xc14   :  { %2111 = vmatprep.subr.mxu0 %v3966_v1 }
 0xc15   :  { %2112 = vmatpush1.msra.mxu0 %v3969_v62 }
 0xc16   :  { %2113 = vmatprep.subr.mxu0 %v3972_v35 }
 0xc17   :  { %2114 = vmatpush1.msra.mxu0 %v3975_v14 }
 0xc18   :  { %2115 = vmatprep.subr.mxu0 %v3978_v15 }
 0xc19   :  { %2116 = vmatpush1.msra.mxu0 %v3981_v17 }
 0xc1a   :  { %3161 = vmatmul.mubr.msk.f32.vlgmr.msra.gmra.mxu0 %vm171_vm1, %v1846_v40  ;;  %2364 = vmatprep.subr.mxu0 %v4012_v42 }
 0xc1b   :  { %2365 = vmatpush1.msra.mxu0 %v4014_v43  ;;  %2412 = vmatprep.mubr.f32.mxu0 %v4453_v7 }
 0xc1c   :  { %2366 = vmatprep.subr.mxu0 %v4016_v45 }
 0xc1d   :  { %2367 = vmatpush1.msra.mxu0 %v4019_v19 }
 0xc1e   :  { %2368 = vmatprep.subr.mxu0 %v4023_v21 }
 0xc1f   :  { %2369 = vmatpush1.msra.mxu0 %v4027_v22 }
 0xc20   :  { %2370 = vmatprep.subr.mxu0 %v4031_v23 }
 0xc21   :  { %2371 = vmatpush1.msra.mxu0 %v4035_v24 }
 0xc22   :  { %2372 = vmatprep.subr.mxu0 %v4039_v25 }
 0xc23   :  { %2373 = vmatpush1.msra.mxu0 %v4043_v26 }
 0xc24   :  { %2374 = vmatprep.subr.mxu0 %v4047_v3 }
 0xc25   :  { %2375 = vmatpush1.msra.mxu0 %v4051_v27 }
 0xc26   :  { %2376 = vmatprep.subr.mxu0 %v4055_v30 }
 0xc27   :  { %2377 = vmatpush1.msra.mxu0 %v4059_v32 }
 0xc28   :  { %2378 = vmatprep.subr.mxu0 %v4072_v59 }
 0xc29   :  { %2379 = vmatpush1.msra.mxu0 %v4075_v39 }
 0xc2a   :  { %2586 = vmatprep.subr.mxu0 %v4079_v34 }
 0xcb2   :  { %v1710_v28 = vpop.f32.mrf.mxu0 }
 0xcb3   :  { %v1711_v40 = vadd.f32 %v1710_v28, %v1634_v4  ;;  %v2068_v4 = vld [vmem:[#allocation2 + $0x5] ss:$8 sm:$0x3] }
 0xcb4   :  { %v1712_v37 = vpop.f32.mrf.mxu0 }
 0xcb5   :  { %v1713_v27 = vadd.f32 %v1712_v37, %v1638_v36 }
 0xcca   :  { %v1932_v30 = vpop.f32.mrf.mxu0 }
 0xccb   :  { %v1937_v32 = vadd.f32 %v1932_v30, %v1711_v40 }
 0xccc   :  { %v1934_v3 = vpop.f32.mrf.mxu0 }
 0xccd   :  { %v1938_v59 = vadd.f32 %v1934_v3, %v1713_v27 }
 0xccf   :  { %v1940_v39 = vmul.f32 %v1938_v59, %v3559_v44 }
 0xcd1   :  { %3260 = vtanh.f32 %v1940_v39 }
 0xcda   :  { %v2151_v34 = vpop.f32.mrf.mxu0 }
 0xcdc   :  { %v2153_v26 = vpop.f32.mrf.mxu0 }
 0xcdd   :  { %v2158_v25 = vcombine.low %v2151_v34, %v2153_v26 }
 0xcde   :  { %v3261_v24 = vpop.eup %3260 }
 0xcdf   :  { %v2165_v23 = vrot.slane %v2158_v25, %v3501_v13  ;;  %v1944_v31 = vmul.f32 %v3261_v24, %v3559_v44  ;;  %v1939_v25 = vmul.f32 0.5, %v1937_v32 }
 0xce1   :  { %v2172_v16 = vrot.slane %v2165_v23, %v3501_v13  ;;  %v1946_v28 = vadd.f32 %v1944_v31, %v3571_v57 }
 0xce3   :  { %v2174_v36 = vadd.f32 %v2172_v16, %v2068_v4  ;;  %1949 = vrot.lane.b32.xlu0 %v1946_v28, %s3415_s0 }
 0xce5   :  { %v2175_v3 = vmul.f32 %v2174_v36, %v3566_v54 }
 0xce7   :  { %3262 = vtanh.f32 %v2175_v3 }
 0xce8   :  { %3264 = vtanh.f32 %v1939_v25 }
 0xcf4   :  { %v3263_v27 = vpop.eup %3262 }
 0xcf5   :  { %v2177_v30 = vmul.f32 %v3263_v27, %v3566_v54  ;;  %v3265_v24 = vpop.eup %3264 }
 0xcf6   :  { %v1943_v23 = vmul.f32 0.5, %v3265_v24 }
 0xcf7   :  { %v2178_v26 = vadd.f32 %v2177_v30, %v3576_v60 }
 0xcf8   :  { %v1945_v59 = vadd.f32 0.5, %v1943_v23 }
 0xcf9   :  { %2181 = vrot.lane.b32.xlu1 %v2178_v26, %s3415_s0  ;;  %v2179_v3 = vmul.f32 %v2178_v26, %v4087_v38  ;;  %v2192_v38 = vrot.slane %v2178_v26, 1 }
 0xcfa   :  { %v1947_v16 = vmul.f32 %v1945_v59, %v4069_v0 }
 0xd55   :  { %v1950_v31 = vpop.permute.xlu0 %1949 }
 0xd56   :  { %v1952_v39 = vmul.f32 %v1950_v31, %v1945_v59  ;;  %v4477_v59 = vld [vmem:[#allocation18_spill] sm:$0xff]  ;;  %v4478_v31 = vld [vmem:[#allocation21_spill] sm:$0xff] }
 0xd58   :  { %1954 = vrot.lane.b32.xlu0 %v1952_v39, %s3415_s0  ;;  %v4479_v39 = vld [vmem:[#allocation22_spill] sm:$0xff] }
 0xd6b   :  { %v2182_v34 = vpop.permute.xlu1 %2181 }
 0xd6c   :  { %v2183_v37 = vrot.slane %v2182_v34, 1  ;;  %v4482_v34 = vld [vmem:[#allocation25_spill] sm:$0xff] }
 0xd6e   :  { %v2185_v40 = vmul.f32 %v2183_v37, %v2178_v26  ;;  %v4476_v26 = vld [vmem:[#allocation28_spill] sm:$0xff]  ;;  %v1981_v37 = vld [vmem:[%s4409_s6] sm:$0x3] }
 0xd70   :  { %2187 = vrot.lane.b32.xlu1 %v2185_v40, %s3415_s0 }
 0xdca   :  { %v1955_v4 = vpop.permute.xlu0 %1954 }
 0xdcb   :  { %v4196_v36 = vadd.f32 %v1955_v4, %v1947_v16  ;;  %v4487_v16 = vld [vmem:[#allocation19_spill] sm:$0xff] }
 0xdcc   :  { %v1986_v4 = vrot.slane %v1981_v37, %v4487_v16 }
 0xdcd   :  { %3266 = vtanh.f32 %v4196_v36 }
 0xdda   :  { %v3267_v32 = vpop.eup %3266 }
 0xddb   :  { %1960 = vrot.lane.b32.xlu0 %v3267_v32, %s3415_s0  ;;  %v1990_v32 = vrot.slane %v1981_v37, %v4464_v2 }
 0xde2   :  { %v2188_v27 = vpop.permute.xlu1 %2187 }
 0xde3   :  { %v4201_v30 = vadd.f32 %v2188_v27, %v2179_v3 }
 0xde5   :  { %3268 = vtanh.f32 %v4201_v30 }
 0xdf2   :  { %v3269_v25 = vpop.eup %3268 }
 0xdf3   :  { %2195 = vrot.lane.b32.xlu1 %v3269_v25, %s3415_s0 }
 0xe4d   :  { %v1961_v24 = vpop.permute.xlu0 %1960 }
 0xe4e   :  { %v1963_v0 = vmul.f32 %v1961_v24, %v1946_v28 }
 0xe50   :  { %1964 = vst.msk [vmem:[#allocation3 + $0x4] sm:$0x1] %vm555_vm3, %v1963_v0  ;;  %3160 = vmatmul.mubr.msk.f32.vlgmr.msra.gmra.mxu1 %vm171_vm1, %v1963_v0 }
 0xe51   :  { %2235 = vmatpush1.msra.mxu1 %v4092_v5  ;;  %2282 = vmatprep.mubr.f32.mxu1 %v4453_v7 }
 0xe52   :  { %2236 = vmatprep.subr.mxu1 %v4094_v18 }
 0xe53   :  { %2237 = vmatpush1.msra.mxu1 %v4098_v10 }
 0xe54   :  { %2238 = vmatprep.subr.mxu1 %v4101_v63 }
 0xe55   :  { %2239 = vmatpush1.msra.mxu1 %v4105_v33 }
 0xe56   :  { %2240 = vmatprep.subr.mxu1 %v4108_v29 }
 0xe57   :  { %2241 = vmatpush1.msra.mxu1 %v4111_v20 }
 0xe58   :  { %2242 = vmatprep.subr.mxu1 %v4114_v8 }
 0xe59   :  { %2243 = vmatpush1.msra.mxu1 %v4117_v9 }
 0xe5a   :  { %2244 = vmatprep.subr.mxu1 %v4120_v11 }
 0xe5b   :  { %2245 = vmatpush1.msra.mxu1 %v4123_v12 }
 0xe5c   :  { %2246 = vmatprep.subr.mxu1 %v4126_v56 }
 0xe5d   :  { %2247 = vmatpush1.msra.mxu1 %v4129_v58 }
 0xe5e   :  { %2248 = vmatprep.subr.mxu1 %v4132_v61 }
 0xe5f   :  { %2249 = vmatpush1.msra.mxu1 %v4135_v6 }
 0xe60   :  { %2453 = vmatprep.subr.mxu1 %v3934_v41 }
 0xe65   :  { %v2196_v28 = vpop.permute.xlu1 %2195 }
 0xe66   :  { %v2198_v23 = vmul.f32 %v2196_v28, %v2192_v38 }
 0xe68   :  { %3162 = vmatmul.mubr.msk.f32.vlgmr.msra.gmra.mxu1 %vm171_vm1, %v2198_v23 }
 0xe69   :  { %2454 = vmatpush1.msra.mxu1 %v3939_v46  ;;  %2501 = vmatprep.mubr.f32.mxu1 %v4453_v7 }
 0xe6a   :  { %2455 = vmatprep.subr.mxu1 %v3941_v47 }
 0xe6b   :  { %2456 = vmatpush1.msra.mxu1 %v3944_v48 }
 0xe6c   :  { %2457 = vmatprep.subr.mxu1 %v3947_v49 }
 0xe6d   :  { %2458 = vmatpush1.msra.mxu1 %v3951_v50 }
 0xe6e   :  { %2459 = vmatprep.subr.mxu1 %v3954_v51 }
 0xe6f   :  { %2460 = vmatpush1.msra.mxu1 %v3957_v52 }
 0xe70   :  { %2461 = vmatprep.subr.mxu1 %v3960_v53 }
 0xe71   :  { %2462 = vmatpush1.msra.mxu1 %v3963_v55 }
 0xe72   :  { %2463 = vmatprep.subr.mxu1 %v3966_v1 }
 0xe73   :  { %2464 = vmatpush1.msra.mxu1 %v3969_v62 }
 0xe74   :  { %2465 = vmatprep.subr.mxu1 %v3972_v35 }
 0xe75   :  { %2466 = vmatpush1.msra.mxu1 %v3975_v14 }
 0xe76   :  { %2467 = vmatprep.subr.mxu1 %v3978_v15 }
 0xe77   :  { %2468 = vmatpush1.msra.mxu1 %v3981_v17 }
 0xe78   :  { %3164 = vmatmul.mubr.msk.f32.vlgmr.msra.gmra.mxu1 %vm171_vm1, %v2198_v23  ;;  %2716 = vmatprep.subr.mxu1 %v4012_v42  ;;  %v4480_v42 = vld [vmem:[#allocation23_spill] sm:$0xff] }
 0xe79   :  { %2717 = vmatpush1.msra.mxu1 %v4014_v43  ;;  %2764 = vmatprep.mubr.f32.mxu1 %v4453_v7  ;;  %v4481_v43 = vld [vmem:[#allocation24_spill] sm:$0xff] }
 0xe7a   :  { %2718 = vmatprep.subr.mxu1 %v4016_v45  ;;  %v4483_v45 = vld [vmem:[#allocation26_spill] sm:$0xff] }
 0xe7b   :  { %2719 = vmatpush1.msra.mxu1 %v4019_v19  ;;  %v4484_v19 = vld [vmem:[#allocation27_spill] sm:$0xff] }
 0xe7c   :  { %2720 = vmatprep.subr.mxu1 %v4023_v21  ;;  %v4485_v21 = vld [vmem:[#allocation20_spill] sm:$0xff] }
 0xe7d   :  { %2721 = vmatpush1.msra.mxu1 %v4027_v22  ;;  %v4486_v22 = vld [vmem:[#allocation29_spill] sm:$0xff] }
 0xe7e   :  { %2722 = vmatprep.subr.mxu1 %v4476_v26 }
 0xe7f   :  { %2723 = vmatpush1.msra.mxu1 %v4477_v59 }
 0xe80   :  { %2724 = vmatprep.subr.mxu1 %v4478_v31 }
 0xe81   :  { %2725 = vmatpush1.msra.mxu1 %v4479_v39 }
 0xe82   :  { %2726 = vmatprep.subr.mxu1 %v4480_v42 }
 0xe83   :  { %2727 = vmatpush1.msra.mxu1 %v4481_v43 }
 0xe84   :  { %2728 = vmatprep.subr.mxu1 %v4482_v34 }
 0xe85   :  { %2729 = vmatpush1.msra.mxu1 %v4483_v45 }
 0xe86   :  { %2730 = vmatprep.subr.mxu1 %v4484_v19  ;;  %v2420_v19 = vld [vmem:[#allocation2 + $0x6] ss:$8 sm:$0x3] }
 0xe87   :  { %2731 = vmatpush1.msra.mxu1 %v4485_v21 }
 0xe88   :  { %2938 = vmatprep.subr.mxu1 %v4486_v22 }
 0xf10   :  { %v2062_v40 = vpop.f32.mrf.mxu1 }
 0xf11   :  { %v2063_v27 = vadd.f32 %v2062_v40, %v1986_v4 }
 0xf12   :  { %v2064_v3 = vpop.f32.mrf.mxu1 }
 0xf13   :  { %v2065_v24 = vadd.f32 %v2064_v3, %v1990_v32 }
 0xf28   :  { %v2284_v25 = vpop.f32.mrf.mxu1 }
 0xf29   :  { %v2289_v0 = vadd.f32 %v2284_v25, %v2063_v27 }
 0xf2a   :  { %v2286_v38 = vpop.f32.mrf.mxu1 }
 0xf2b   :  { %v2290_v28 = vadd.f32 %v2286_v38, %v2065_v24  ;;  %v2291_v32 = vmul.f32 0.5, %v2289_v0 }
 0xf2d   :  { %v2292_v23 = vmul.f32 %v2290_v28, %v3559_v44 }
 0xf2f   :  { %3270 = vtanh.f32 %v2292_v23 }
 0xf38   :  { %v2503_v26 = vpop.f32.mrf.mxu1 }
 0xf3a   :  { %v2505_v59 = vpop.f32.mrf.mxu1 }
 0xf3b   :  { %v2510_v31 = vcombine.low %v2503_v26, %v2505_v59 }
 0xf3c   :  { %v3271_v39 = vpop.eup %3270 }
 0xf3d   :  { %v2517_v42 = vrot.slane %v2510_v31, %v3501_v13  ;;  %v2296_v43 = vmul.f32 %v3271_v39, %v3559_v44 }
 0xf3f   :  { %v2524_v34 = vrot.slane %v2517_v42, %v3501_v13  ;;  %v2298_v45 = vadd.f32 %v2296_v43, %v3571_v57 }
 0xf41   :  { %v2526_v21 = vadd.f32 %v2524_v34, %v2420_v19  ;;  %2301 = vrot.lane.b32.xlu0 %v2298_v45, %s3415_s0 }
 0xf43   :  { %v2527_v22 = vmul.f32 %v2526_v21, %v3566_v54 }
 0xf45   :  { %3272 = vtanh.f32 %v2527_v22 }
 0xf46   :  { %3274 = vtanh.f32 %v2291_v32 }
 0xf52   :  { %v3273_v37 = vpop.eup %3272 }
 0xf53   :  { %v2529_v40 = vmul.f32 %v3273_v37, %v3566_v54  ;;  %v3275_v3 = vpop.eup %3274 }
 0xf54   :  { %v2295_v27 = vmul.f32 0.5, %v3275_v3  ;;  %v2772_v3 = vld [vmem:[#allocation2 + $0x7] ss:$8 sm:$0x3] }
 0xf55   :  { %v2530_v4 = vadd.f32 %v2529_v40, %v3576_v60 }
 0xf56   :  { %v2297_v25 = vadd.f32 0.5, %v2295_v27 }
 0xf57   :  { %2533 = vrot.lane.b32.xlu1 %v2530_v4, %s3415_s0  ;;  %v2531_v42 = vmul.f32 %v2530_v4, %v4201_v30  ;;  %v2544_v30 = vrot.slane %v2530_v4, 1 }
 0xf58   :  { %v2299_v59 = vmul.f32 %v2297_v25, %v4196_v36 }
 0xfb3   :  { %v2302_v24 = vpop.permute.xlu0 %2301 }
 0xfb4   :  { %v2304_v38 = vmul.f32 %v2302_v24, %v2297_v25 }
 0xfb6   :  { %2306 = vrot.lane.b32.xlu0 %v2304_v38, %s3415_s0 }
 0xfc9   :  { %v2534_v28 = vpop.permute.xlu1 %2533 }
 0xfca   :  { %v2535_v23 = vrot.slane %v2534_v28, 1 }
 0xfcc   :  { %v2537_v26 = vmul.f32 %v2535_v23, %v2530_v4 }
 0xfce   :  { %2539 = vrot.lane.b32.xlu1 %v2537_v26, %s3415_s0 }
0x1028   :  { %v2307_v31 = vpop.permute.xlu0 %2306 }
0x1029   :  { %v4278_v39 = vadd.f32 %v2307_v31, %v2299_v59 }
0x102b   :  { %3276 = vtanh.f32 %v4278_v39 }
0x1038   :  { %v3277_v0 = vpop.eup %3276 }
0x1039   :  { %2312 = vrot.lane.b32.xlu0 %v3277_v0, %s3415_s0 }
0x1040   :  { %v2540_v43 = vpop.permute.xlu1 %2539 }
0x1041   :  { %v4283_v34 = vadd.f32 %v2540_v43, %v2531_v42 }
0x1043   :  { %3278 = vtanh.f32 %v4283_v34 }
0x1050   :  { %v3279_v19 = vpop.eup %3278 }
0x1051   :  { %2547 = vrot.lane.b32.xlu1 %v3279_v19, %s3415_s0 }
0x10ab   :  { %v2313_v21 = vpop.permute.xlu0 %2312 }
0x10ac   :  { %v2315_v36 = vmul.f32 %v2313_v21, %v2298_v45 }
0x10ae   :  { %2316 = vst.msk [vmem:[#allocation3 + $0x5] sm:$0x1] %vm555_vm3, %v2315_v36  ;;  %3163 = vmatmul.mubr.msk.f32.vlgmr.msra.gmra.mxu0 %vm171_vm1, %v2315_v36 }
0x10af   :  { %2587 = vmatpush1.msra.mxu0 %v4092_v5  ;;  %2634 = vmatprep.mubr.f32.mxu0 %v4453_v7 }
0x10b0   :  { %2588 = vmatprep.subr.mxu0 %v4094_v18 }
0x10b1   :  { %2589 = vmatpush1.msra.mxu0 %v4098_v10 }
0x10b2   :  { %2590 = vmatprep.subr.mxu0 %v4101_v63 }
0x10b3   :  { %2591 = vmatpush1.msra.mxu0 %v4105_v33 }
0x10b4   :  { %2592 = vmatprep.subr.mxu0 %v4108_v29 }
0x10b5   :  { %2593 = vmatpush1.msra.mxu0 %v4111_v20 }
0x10b6   :  { %2594 = vmatprep.subr.mxu0 %v4114_v8 }
0x10b7   :  { %2595 = vmatpush1.msra.mxu0 %v4117_v9 }
0x10b8   :  { %2596 = vmatprep.subr.mxu0 %v4120_v11 }
0x10b9   :  { %2597 = vmatpush1.msra.mxu0 %v4123_v12 }
0x10ba   :  { %2598 = vmatprep.subr.mxu0 %v4126_v56 }
0x10bb   :  { %2599 = vmatpush1.msra.mxu0 %v4129_v58 }
0x10bc   :  { %2600 = vmatprep.subr.mxu0 %v4132_v61 }
0x10bd   :  { %2601 = vmatpush1.msra.mxu0 %v4135_v6 }
0x10be   :  { %2805 = vmatprep.subr.mxu0 %v3934_v41  ;;  %v2333_v41 = vld [vmem:[%s4409_s6] sm:$0x3] }
0x10c3   :  { %v2548_v45 = vpop.permute.xlu1 %2547 }
0x10c4   :  { %v2550_v22 = vmul.f32 %v2548_v45, %v2544_v30 }
0x10c6   :  { %3165 = vmatmul.mubr.msk.f32.vlgmr.msra.gmra.mxu0 %vm171_vm1, %v2550_v22 }
0x10c7   :  { %2806 = vmatpush1.msra.mxu0 %v3939_v46  ;;  %2853 = vmatprep.mubr.f32.mxu0 %v4453_v7 }
0x10c8   :  { %2807 = vmatprep.subr.mxu0 %v3941_v47  ;;  %v2338_v47 = vrot.slane %v2333_v41, %v4487_v16 }
0x10c9   :  { %2808 = vmatpush1.msra.mxu0 %v3944_v48  ;;  %v2342_v48 = vrot.slane %v2333_v41, %v4464_v2 }
0x10ca   :  { %2809 = vmatprep.subr.mxu0 %v3947_v49 }
0x10cb   :  { %2810 = vmatpush1.msra.mxu0 %v3951_v50 }
0x10cc   :  { %2811 = vmatprep.subr.mxu0 %v3954_v51 }
0x10cd   :  { %2812 = vmatpush1.msra.mxu0 %v3957_v52 }
0x10ce   :  { %2813 = vmatprep.subr.mxu0 %v3960_v53 }
0x10cf   :  { %2814 = vmatpush1.msra.mxu0 %v3963_v55 }
0x10d0   :  { %2815 = vmatprep.subr.mxu0 %v3966_v1 }
0x10d1   :  { %2816 = vmatpush1.msra.mxu0 %v3969_v62 }
0x10d2   :  { %2817 = vmatprep.subr.mxu0 %v3972_v35 }
0x10d3   :  { %2818 = vmatpush1.msra.mxu0 %v3975_v14 }
0x10d4   :  { %2819 = vmatprep.subr.mxu0 %v3978_v15 }
0x10d5   :  { %2820 = vmatpush1.msra.mxu0 %v3981_v17 }
0x10d6   :  { %3167 = vmatmul.mubr.msk.f32.vlgmr.msra.gmra.mxu0 %vm171_vm1, %v2550_v22  ;;  %3180 = vmatprep.subr.mxu0 %v4453_v7 }
0x10d7   :  { %3196 = vmatprep.mubr.msk.f32.mxu0 %vm3418_vm4, %v4453_v7 }
0x116e   :  { %v2414_v46 = vpop.f32.mrf.mxu0 }
0x116f   :  { %v2415_v50 = vadd.f32 %v2414_v46, %v2338_v47 }
0x1170   :  { %v2416_v49 = vpop.f32.mrf.mxu0 }
0x1171   :  { %v2417_v52 = vadd.f32 %v2416_v49, %v2342_v48 }
0x1186   :  { %v2636_v51 = vpop.f32.mrf.mxu0 }
0x1187   :  { %v2641_v53 = vadd.f32 %v2636_v51, %v2415_v50 }
0x1188   :  { %v2638_v55 = vpop.f32.mrf.mxu0 }
0x1189   :  { %v2642_v1 = vadd.f32 %v2638_v55, %v2417_v52  ;;  %v2643_v23 = vmul.f32 0.5, %v2641_v53 }
0x118b   :  { %v2644_v62 = vmul.f32 %v2642_v1, %v3559_v44  ;;  %v3045_v1 = vld [vmem:[#allocation11 + $0x38] sm:$0xff] }
0x118c   :  { %3181 = vmatpush3.msra.mxu0 %v3045_v1 }
0x118d   :  { %3280 = vtanh.f32 %v2644_v62  ;;  %v3044_v62 = vld [vmem:[#allocation11 + $0x30] sm:$0xff]  ;;  %3182 = vmatprep.subr.mxu0 %v4453_v7 }
0x118e   :  { %3183 = vmatpush3.msra.mxu0 %v3044_v62 }
0x118f   :  { %3184 = vmatprep.subr.mxu0 %v4453_v7 }
0x1196   :  { %v2855_v35 = vpop.f32.mrf.mxu0 }
0x1198   :  { %v2857_v14 = vpop.f32.mrf.mxu0 }
0x1199   :  { %v2862_v15 = vcombine.low %v2855_v35, %v2857_v14 }
0x119a   :  { %v3281_v17 = vpop.eup %3280 }
0x119b   :  { %v2869_v37 = vrot.slane %v2862_v15, %v3501_v13  ;;  %v2648_v40 = vmul.f32 %v3281_v17, %v3559_v44  ;;  %v3042_v15 = vld [vmem:[#allocation11 + $0x20] sm:$0xff]  ;;  %v3041_v17 = vld [vmem:[#allocation11 + $0x18] sm:$0xff] }
0x119d   :  { %v2876_v4 = vrot.slane %v2869_v37, %v3501_v13  ;;  %v2650_v32 = vadd.f32 %v2648_v40, %v3571_v57  ;;  %v3040_v37 = vld [vmem:[#allocation11 + $0x10] sm:$0xff]  ;;  %v3039_v40 = vld [vmem:[#allocation11 + $0x8] sm:$0xff] }
0x119f   :  { %v2878_v27 = vadd.f32 %v2876_v4, %v2772_v3  ;;  %2653 = vrot.lane.b32.xlu0 %v2650_v32, %s3415_s0  ;;  %v3038_v4 = vld [vmem:[#allocation11] sm:$0xff] }
0x11a1   :  { %v2879_v25 = vmul.f32 %v2878_v27, %v3566_v54 }
0x11a3   :  { %3282 = vtanh.f32 %v2879_v25 }
0x11a4   :  { %3284 = vtanh.f32 %v2643_v23 }
0x11b0   :  { %v3283_v24 = vpop.eup %3282 }
0x11b1   :  { %v2881_v38 = vmul.f32 %v3283_v24, %v3566_v54  ;;  %v3285_v26 = vpop.eup %3284 }
0x11b2   :  { %v2647_v13 = vmul.f32 0.5, %v3285_v26 }
0x11b3   :  { %v2882_v28 = vadd.f32 %v2881_v38, %v3576_v60 }
0x11b4   :  { %v2649_v59 = vadd.f32 0.5, %v2647_v13 }
0x11b5   :  { %2885 = vrot.lane.b32.xlu1 %v2882_v28, %s3415_s0  ;;  %v2883_v30 = vmul.f32 %v2882_v28, %v4283_v34 }
0x11b6   :  { %v2651_v54 = vmul.f32 %v2649_v59, %v4278_v39 }
0x1211   :  { %v2654_v31 = vpop.permute.xlu0 %2653 }
0x1212   :  { %v2656_v0 = vmul.f32 %v2654_v31, %v2649_v59 }
0x1214   :  { %2658 = vrot.lane.b32.xlu0 %v2656_v0, %s3415_s0 }
0x1227   :  { %v2886_v42 = vpop.permute.xlu1 %2885 }
0x1228   :  { %v2887_v43 = vrot.slane %v2886_v42, 1 }
0x122a   :  { %v2889_v19 = vmul.f32 %v2887_v43, %v2882_v28 }
0x122c   :  { %2891 = vrot.lane.b32.xlu1 %v2889_v19, %s3415_s0 }
0x1286   :  { %v2659_v21 = vpop.permute.xlu0 %2658 }
0x1287   :  { %v4343_v60 = vadd.f32 %v2659_v21, %v2651_v54 }
0x1289   :  { %3286 = vtanh.f32 %v4343_v60 }
0x1296   :  { %v3287_v36 = vpop.eup %3286 }
0x1297   :  { %2664 = vrot.lane.b32.xlu0 %v3287_v36, %s3415_s0 }
0x129e   :  { %v2892_v45 = vpop.permute.xlu1 %2891 }
0x129f   :  { %v2894_v22 = vadd.f32 %v2892_v45, %v2883_v30 }
0x12a1   :  { %3288 = vtanh.f32 %v2894_v22  ;;  %v3026_v55 = vrot.slane %v2894_v22, %v4487_v16 }
0x12ae   :  { %v3289_v41 = vpop.eup %3288 }
0x12af   :  { %2899 = vrot.lane.b32.xlu1 %v3289_v41, %s3415_s0 }
0x1309   :  { %v2665_v46 = vpop.permute.xlu0 %2664 }
0x130a   :  { %v2667_v47 = vmul.f32 %v2665_v46, %v2650_v32 }
0x130c   :  { %2668 = vst.msk [vmem:[#allocation3 + $0x6] sm:$0x1] %vm555_vm3, %v2667_v47  ;;  %3166 = vmatmul.mubr.msk.f32.vlgmr.msra.gmra.mxu1 %vm171_vm1, %v2667_v47 }
0x130d   :  { %2939 = vmatpush1.msra.mxu1 %v4092_v5  ;;  %2986 = vmatprep.mubr.f32.mxu1 %v4453_v7  ;;  %v2896_v5 = vrot.slane %v2882_v28, 1 }
0x130e   :  { %2940 = vmatprep.subr.mxu1 %v4094_v18 }
0x130f   :  { %2941 = vmatpush1.msra.mxu1 %v4098_v10 }
0x1310   :  { %2942 = vmatprep.subr.mxu1 %v4101_v63  ;;  %v2685_v63 = vld [vmem:[%s4409_s6] sm:$0x3] }
0x1311   :  { %2943 = vmatpush1.msra.mxu1 %v4105_v33 }
0x1312   :  { %2944 = vmatprep.subr.mxu1 %v4108_v29  ;;  %v2690_v29 = vrot.slane %v2685_v63, %v4487_v16 }
0x1313   :  { %2945 = vmatpush1.msra.mxu1 %v4111_v20  ;;  %v2694_v20 = vrot.slane %v2685_v63, %v4464_v2 }
0x1314   :  { %2946 = vmatprep.subr.mxu1 %v4114_v8 }
0x1315   :  { %2947 = vmatpush1.msra.mxu1 %v4117_v9 }
0x1316   :  { %2948 = vmatprep.subr.mxu1 %v4120_v11 }
0x1317   :  { %2949 = vmatpush1.msra.mxu1 %v4123_v12 }
0x1318   :  { %2950 = vmatprep.subr.mxu1 %v4126_v56 }
0x1319   :  { %2951 = vmatpush1.msra.mxu1 %v4129_v58 }
0x131a   :  { %2952 = vmatprep.subr.mxu1 %v4132_v61 }
0x131b   :  { %2953 = vmatpush1.msra.mxu1 %v4135_v6 }
0x1321   :  { %v2900_v18 = vpop.permute.xlu1 %2899 }
0x1322   :  { %v2902_v10 = vmul.f32 %v2900_v18, %v2896_v5 }
0x1324   :  { %3021 = vst.msk [vmem:[#allocation4] sm:$0x1] %vm555_vm3, %v2902_v10  ;;  %3168 = vmatmul.mubr.msk.f32.vlgmr.msra.gmra.mxu1 %vm171_vm1, %v2902_v10 }
0x13cc   :  { %v2766_v33 = vpop.f32.mrf.mxu1 }
0x13cd   :  { %v2767_v9 = vadd.f32 %v2766_v33, %v2690_v29 }
0x13ce   :  { %v2768_v8 = vpop.f32.mrf.mxu1 }
0x13cf   :  { %v2769_v12 = vadd.f32 %v2768_v8, %v2694_v20 }
0x13e4   :  { %v2988_v11 = vpop.f32.mrf.mxu1 }
0x13e5   :  { %v2993_v56 = vadd.f32 %v2988_v11, %v2767_v9 }
0x13e6   :  { %v2990_v58 = vpop.f32.mrf.mxu1 }
0x13e7   :  { %v2994_v61 = vadd.f32 %v2990_v58, %v2769_v12  ;;  %v2995_v49 = vmul.f32 0.5, %v2993_v56 }
0x13e9   :  { %v2996_v6 = vmul.f32 %v2994_v61, %v3559_v44 }
0x13eb   :  { %3290 = vtanh.f32 %v2996_v6 }
0x13ec   :  { %3292 = vtanh.f32 %v2995_v49 }
0x13f8   :  { %v3291_v39 = vpop.eup %3290 }
0x13f9   :  { %v3000_v34 = vmul.f32 %v3291_v39, %v3559_v44  ;;  %v3293_v2 = vpop.eup %3292  ;;  %v3043_v44 = vld [vmem:[#allocation11 + $0x28] sm:$0xff] }
0x13fa   :  { %v2999_v50 = vmul.f32 0.5, %v3293_v2  ;;  %3185 = vmatpush3.msra.mxu0 %v3043_v44 }
0x13fb   :  { %v3002_v48 = vadd.f32 %v3000_v34, %v3571_v57  ;;  %3186 = vmatprep.subr.mxu0 %v4453_v7 }
0x13fc   :  { %v3001_v51 = vadd.f32 0.5, %v2999_v50  ;;  %3187 = vmatpush3.msra.mxu0 %v3042_v15 }
0x13fd   :  { %3005 = vrot.lane.b32.xlu0 %v3002_v48, %s3415_s0  ;;  %3188 = vmatprep.subr.mxu0 %v4453_v7 }
0x13fe   :  { %v3003_v57 = vmul.f32 %v3001_v51, %v4343_v60  ;;  %3189 = vmatpush3.msra.mxu0 %v3041_v17 }
0x13ff   :  { %3190 = vmatprep.subr.mxu0 %v4453_v7 }
0x1400   :  { %3191 = vmatpush3.msra.mxu0 %v3040_v37 }
0x1401   :  { %3192 = vmatprep.subr.mxu0 %v4453_v7 }
0x1402   :  { %3193 = vmatpush3.msra.mxu0 %v3039_v40 }
0x1403   :  { %3194 = vmatprep.subr.mxu0 %v4453_v7  ;;  %v3169_v7 = vld [vmem:[%s4411_s8] ss:$0 sm:$0xff] }
0x1404   :  { %3195 = vmatpush3.msra.mxu0 %v3038_v4 }
0x146f   :  { %v3006_v52 = vpop.permute.xlu0 %3005 }
0x1470   :  { %v3008_v53 = vmul.f32 %v3006_v52, %v3001_v51 }
0x1472   :  { %3010 = vrot.lane.b32.xlu1 %v3008_v53, %s3415_s0 }
0x1476   :  { %3027 = vrot.lane.b32.xlu1 %v3026_v55, %s3415_s0 }
0x14e4   :  { %v3011_v35 = vpop.permute.xlu1 %3010 }
0x14e5   :  { %v3013_v14 = vadd.f32 %v3011_v35, %v3003_v57 }
0x14e7   :  { %3294 = vtanh.f32 %v3013_v14 }
0x14e8   :  { %v3028_v16 = vpop.permute.xlu1 %3027 }
0x14e9   :  { %3030 = vst.msk [vmem:[#allocation4 + $0x1] sm:$0x1] %vm555_vm3, %v3028_v16 }
0x14f4   :  { %v3295_v32 = vpop.eup %3294 }
0x14f5   :  { %3016 = vrot.lane.b32.xlu0 %v3295_v32, %s3415_s0 }
0x14f9   :  { %3033 = vrot.lane.b32.xlu0 %v3013_v14, %s3415_s0 }
0x1567   :  { %v3017_v3 = vpop.permute.xlu0 %3016 }
0x1568   :  { %v3019_v27 = vmul.f32 %v3017_v3, %v3002_v48 }
0x156a   :  { %3020 = vst.msk [vmem:[#allocation3 + $0x7] sm:$0x1] %vm555_vm3, %v3019_v27  ;;  %3031 = vst.msk [vmem:[#allocation4 + $0x2] sm:$0x1] %vm555_vm3, %v3019_v27 }
0x156b   :  { %v3034_v25 = vpop.permute.xlu0 %3033 }
0x156c   :  { %3036 = vst.msk [vmem:[#allocation4 + $0x3] sm:$0x1] %vm555_vm3, %v3034_v25 }
0x1571   :  { %v3037_v24 = vld [vmem:[#allocation3] sm:$0xff] }
0x1572   :  { %3197 = vmatmul.mubr.msk.f32.vlgmr.msra.gmra.mxu0 %vm171_vm1, %v3037_v24 }
0x1632   :  { %v3122_v38 = vpop.f32.mrf.mxu0 }
0x1633   :  { %v3123_v28 = vadd.f32 %v3169_v7, %v3122_v38 }
0x1634   :  { %v3198_v23 = vpop.f32.mrf.mxu0 }
0x1635   :  { %3126 = vst [vmem:[#allocation13] sm:$0xff] %v3123_v28 }
0x1636   :  { %3387 = shalt.err (!%p3384_p10)
}
0x1637   :  { %3136 = dma.vmem_to_hbm [thread:$0]  %s3134_s28, 128, %s4412_s9, [#allocation7]  }
0x1638   :  { %3402 = dma.done.wait [#allocation7], 128  }
0x1639   :  { %3403 = vsyncadd [#allocation7], 4294967168 }
0x163a   :  { %3140 = vsyncpa [#allocation6], 1 }
0x163b   :  { %3141 = vsyncpa [#allocation9], 1 }
0x163c   :  { %3142 = vsyncpa [#allocation12], 1 }
0x163d   :  { %3143 = vsyncpa [#allocation7], 1 }

</bundles_post_ra>
